<compile_context>
chip_gen: v7x
topology: tpu7x:2x2x1
jax: 0.10.0
libtpu: 0.0.40
codegen_flags: <defaults>
</compile_context>

<pallas_src>
import functools

import jax
import jax.numpy as jnp
from jax.experimental import pallas as pl
from jax.experimental.pallas import tpu as pltpu

_LANE = 128
_NEG = -1e30                     # ~ -inf for padded logit lanes (finite -> no inf-inf NaNs)
_SMALL_FUSED_MAX = 2048          # <= this many nodes: single fully fused kernel
_RESIDENT_P_MAX_BYTES = 4 * 1024 * 1024  # keep projected features VMEM-resident up to 4 MiB


def _round_up(x, m):
    return ((x + m - 1) // m) * m


def _pad2d(x, rows, cols, fill=0.0):
    r, c = x.shape
    return jnp.pad(x, ((0, rows - r), (0, cols - c)), constant_values=fill)


def _log_softmax_lanes(z):
    m = jnp.max(z, axis=1, keepdims=True)
    s = z - m
    return s - jnp.log(jnp.sum(jnp.exp(s), axis=1, keepdims=True))


# ----------------------------------------------------------------------------
# Small-graph path: both layers + linear + log_softmax in one VMEM-resident
# kernel (A fits easily in VMEM; removes all launch / HBM-round-trip overhead).
# ----------------------------------------------------------------------------
def _fused_kernel(a_ref, x_ref, w1_ref, b1_ref, w23_ref, b23_ref, o_ref):
    # Layer 1: H = relu(A_hat @ (X @ W1) + b1)
    p1 = jnp.dot(x_ref[...], w1_ref[...], preferred_element_type=jnp.float32)
    h = jnp.maximum(
        jnp.dot(a_ref[...], p1.astype(jnp.bfloat16),
                preferred_element_type=jnp.float32) + b1_ref[...], 0.0)
    # F.dropout(..., training=False) -> identity at inference.
    # TODO(synk): stochastic dropout via pltpu.prng_seed/prng_random_bits if
    #             training-mode semantics are ever required.
    # Layer 2 + folded Linear: log_softmax(A_hat @ (H @ W23) + b23)
    p2 = jnp.dot(h, w23_ref[...], preferred_element_type=jnp.float32)
    z = jnp.dot(a_ref[...], p2.astype(jnp.bfloat16),
                preferred_element_type=jnp.float32) + b23_ref[...]
    o_ref[...] = _log_softmax_lanes(z)


def _fused_forward(prep, x_p):
    n_pad, out_p = prep["n_pad"], prep["out_p"]
    vmem = pl.BlockSpec(memory_space=pltpu.MemorySpace.VMEM)
    return pl.pallas_call(
        _fused_kernel,
        out_shape=jax.ShapeDtypeStruct((n_pad, out_p), jnp.float32),
        in_specs=[vmem] * 6,
        out_specs=vmem,
    )(prep["a"], x_p, prep["w1"], prep["b1"], prep["w23"], prep["b23"])


# ----------------------------------------------------------------------------
# Large-graph path, kernel 1: projection  P = X @ W  (grid over node tiles).
# ----------------------------------------------------------------------------
def _project_kernel(x_ref, w_ref, o_ref):
    o_ref[...] = jnp.dot(
        x_ref[...], w_ref[...], preferred_element_type=jnp.float32
    ).astype(o_ref.dtype)


def _project(x, w, tile, out_dtype):
    n, cin = x.shape
    cout = w.shape[1]
    return pl.pallas_call(
        _project_kernel,
        out_shape=jax.ShapeDtypeStruct((n, cout), out_dtype),
        grid_spec=pltpu.PrefetchScalarGridSpec(
            num_scalar_prefetch=0,
            grid=(n // tile,),
            in_specs=[
                pl.BlockSpec((tile, cin), lambda i: (i, 0)),
                pl.BlockSpec((cin, cout), lambda i: (0, 0)),
            ],
            out_specs=pl.BlockSpec((tile, cout), lambda i: (i, 0)),
        ),
        compiler_params=pltpu.CompilerParams(
            dimension_semantics=("parallel",)),
    )(x, w)


# ----------------------------------------------------------------------------
# Large-graph path, kernel 2: P2 = relu(A @ P1 + b1) @ W23   (bf16 output).
# grid = (rows [parallel], contraction [arbitrary, last]); f32 scratch
# accumulator (output is bf16); layer-2 projection fused in the epilogue.
# ----------------------------------------------------------------------------
def _agg1_kernel(a_ref, p_ref, b1_ref, w23_ref, o_ref, acc_ref, *,
                 tile_k, resident_p):
    k = pl.program_id(1)

    @pl.when(k == 0)
    def _():
        acc_ref[...] = jnp.zeros_like(acc_ref)

    if resident_p:
        start = pl.multiple_of(k * tile_k, tile_k)
        p_blk = p_ref[pl.ds(start, tile_k), :]
    else:
        p_blk = p_ref[...]
    acc_ref[...] += jnp.dot(a_ref[...], p_blk,
                            preferred_element_type=jnp.float32)

    @pl.when(k == pl.num_programs(1) - 1)
    def _():
        h = jnp.maximum(acc_ref[...] + b1_ref[...], 0.0)  # ReLU; dropout = id
        o_ref[...] = jnp.dot(
            h, w23_ref[...], preferred_element_type=jnp.float32
        ).astype(o_ref.dtype)


def _aggregate1(a, p, b1, w23, tm, tk, resident_p):
    n_pad = a.shape[0]
    hid = p.shape[1]
    out_c = w23.shape[1]
    p_spec = (pl.BlockSpec((n_pad, hid), lambda i, k: (0, 0)) if resident_p
              else pl.BlockSpec((tk, hid), lambda i, k: (k, 0)))
    return pl.pallas_call(
        functools.partial(_agg1_kernel, tile_k=tk, resident_p=resident_p),
        out_shape=jax.ShapeDtypeStruct((n_pad, out_c), jnp.bfloat16),
        grid_spec=pltpu.PrefetchScalarGridSpec(
            num_scalar_prefetch=0,
            grid=(n_pad // tm, n_pad // tk),
            in_specs=[
                pl.BlockSpec((tm, tk), lambda i, k: (i, k)),
                p_spec,
                pl.BlockSpec((1, hid), lambda i, k: (0, 0)),
                pl.BlockSpec((hid, out_c), lambda i, k: (0, 0)),
            ],
            out_specs=pl.BlockSpec((tm, out_c), lambda i, k: (i, 0)),
            scratch_shapes=[pltpu.VMEM((tm, hid), jnp.float32)],
        ),
        compiler_params=pltpu.CompilerParams(
            dimension_semantics=("parallel", "arbitrary")),
    )(a, p, b1, w23)


# ----------------------------------------------------------------------------
# Large-graph path, kernel 3: out = log_softmax(A @ P2 + b23)   (f32 output).
# Accumulates directly into the resident f32 output block (no scratch).
# ----------------------------------------------------------------------------
def _agg2_kernel(a_ref, p_ref, b_ref, o_ref, *, tile_k, resident_p):
    k = pl.program_id(1)

    @pl.when(k == 0)
    def _():
        o_ref[...] = jnp.zeros_like(o_ref)

    if resident_p:
        start = pl.multiple_of(k * tile_k, tile_k)
        p_blk = p_ref[pl.ds(start, tile_k), :]
    else:
        p_blk = p_ref[...]
    o_ref[...] += jnp.dot(a_ref[...], p_blk,
                          preferred_element_type=jnp.float32)

    @pl.when(k == pl.num_programs(1) - 1)
    def _():
        # b23's padded lanes are -1e30 (f32) -> log_softmax exact on real lanes.
        o_ref[...] = _log_softmax_lanes(o_ref[...] + b_ref[...])


def _aggregate2(a, p, b, tm, tk, resident_p):
    n_pad = a.shape[0]
    c = p.shape[1]
    p_spec = (pl.BlockSpec((n_pad, c), lambda i, k: (0, 0)) if resident_p
              else pl.BlockSpec((tk, c), lambda i, k: (k, 0)))
    return pl.pallas_call(
        functools.partial(_agg2_kernel, tile_k=tk, resident_p=resident_p),
        out_shape=jax.ShapeDtypeStruct((n_pad, c), jnp.float32),
        grid_spec=pltpu.PrefetchScalarGridSpec(
            num_scalar_prefetch=0,
            grid=(n_pad // tm, n_pad // tk),
            in_specs=[
                pl.BlockSpec((tm, tk), lambda i, k: (i, k)),
                p_spec,
                pl.BlockSpec((1, c), lambda i, k: (0, 0)),
            ],
            out_specs=pl.BlockSpec((tm, c), lambda i, k: (i, 0)),
        ),
        compiler_params=pltpu.CompilerParams(
            dimension_semantics=("parallel", "arbitrary")),
    )(a, p, b)


# ----------------------------------------------------------------------------
# One-time preprocessing (hoisted out of the per-call forward) + forward.
# ----------------------------------------------------------------------------
def prepare_gcn(a_hat, w1, b1, w2, b2, w3, b3, *, force_tiled=False,
                resident_p=None):
    """Pads + casts A_hat to bf16 once (not per forward call), folds the final
    Linear into GCNConv-2 (exact: no nonlinearity between) and pads all
    parameters lane-dense. Returns a dict consumed by gcn_forward."""
    n = a_hat.shape[0]
    c_in, hidden = w1.shape
    out_c = w3.shape[1]

    w23 = jnp.dot(w2, w3)                        # (hidden, out_c)
    b23 = jnp.dot(b2, w3) + b3                   # (1, out_c)

    c_in_p = _round_up(c_in, _LANE)
    hid_p = _round_up(hidden, _LANE)
    out_p = _round_up(out_c, _LANE)

    small = (n <= _SMALL_FUSED_MAX) and not force_tiled
    if small:
        n_pad = _round_up(max(n, 8), _LANE)
        tm = tk = proj_tile = n_pad              # unused on the fused path
    else:
        n_pad = _round_up(n, 512)
        tm = 1024 if n_pad % 1024 == 0 else 512
        tk = next(t for t in (2048, 1024, 512) if n_pad % t == 0)
        proj_tile = 512
    if resident_p is None:
        resident_p = n_pad * hid_p * 2 <= _RESIDENT_P_MAX_BYTES

    # A_hat is the O(N^2) operand: bf16 halves its HBM stream; the pad + cast
    # happens here exactly once (hoisted out of the hot forward path).
    a_p = _pad2d(a_hat.astype(jnp.float32), n_pad, n_pad).astype(jnp.bfloat16)
    # TODO(synk): int8 (v5e/v6e) or fp8-e4m3 (v7x) A_hat with a rescale in the
    #             epilogue would halve the dominant stream again if accuracy allows.
    w1_p = _pad2d(w1.astype(jnp.float32), c_in_p, hid_p)
    b1_p = _pad2d(b1.astype(jnp.float32).reshape(1, -1), 1, hid_p)   # pad lanes = 0
    w23_p = _pad2d(w23, hid_p, out_p)
    b23_p = jnp.concatenate(                                         # pad lanes ~ -inf
        [b23.reshape(1, -1),
         jnp.full((1, out_p - out_c), _NEG, jnp.float32)], axis=1)

    return dict(
        n=n, n_pad=n_pad, c_in_p=c_in_p, hid_p=hid_p, out_c=out_c, out_p=out_p,
        small=small, tm=tm, tk=tk, proj_tile=proj_tile, resident_p=resident_p,
        a=a_p, w1=w1_p, b1=b1_p, w23=w23_p, b23=b23_p,
    )


def gcn_forward(prep, x):
    n, n_pad = prep["n"], prep["n_pad"]
    x_p = _pad2d(x.astype(jnp.float32), n_pad, prep["c_in_p"])
    if prep["small"]:
        logp = _fused_forward(prep, x_p)
    else:
        p1 = _project(x_p, prep["w1"], prep["proj_tile"], jnp.bfloat16)
        p2 = _aggregate1(prep["a"], p1, prep["b1"], prep["w23"],
                         prep["tm"], prep["tk"], prep["resident_p"])
        logp = _aggregate2(prep["a"], p2, prep["b23"],
                           prep["tm"], prep["tk"], prep["resident_p"])
    return logp[:n, :prep["out_c"]]


def build_normalized_adjacency(edge_index, num_nodes):
    """Dense A_hat = D^{-1/2}(A + I)D^{-1/2} with PyG conventions:
    edge (src=edge_index[0,e], tgt=edge_index[1,e]) sends a message src -> tgt,
    so A[tgt, src] = 1; degree computed on the target index (incl. self loop).
    # TODO(synk): for very large sparse graphs, a scalar-prefetch CSR gather
    #             formulation would avoid the O(N^2) densification.
    """
    src, tgt = edge_index[0], edge_index[1]
    a = jnp.zeros((num_nodes, num_nodes), jnp.float32).at[tgt, src].add(1.0)
    a = a + jnp.eye(num_nodes, dtype=jnp.float32)
    deg = a.sum(axis=1)
    d_inv_sqrt = jnp.where(deg > 0, 1.0 / jnp.sqrt(deg), 0.0)
    return d_inv_sqrt[:, None] * a * d_inv_sqrt[None, :]


def reference_forward(a_hat, x, w1, b1, w2, b2, w3, b3):
    h = jnp.maximum(a_hat @ (x @ w1) + b1, 0.0)
    h = a_hat @ (h @ w2) + b2
    logits = h @ w3 + b3
    return jax.nn.log_softmax(logits, axis=1)


if __name__ == "__main__":
    # Small, GCN-consistent shapes (200 nodes -> fused path pads N to 256;
    # the tiled path is also smoke-tested below at a 512-padded size).
    num_nodes = 200
    num_edges = 600
    in_channels = 8
    hidden_channels = 32
    out_channels = 4
    half_hidden = hidden_channels // 2

    key = jax.random.PRNGKey(0)
    kx, ke, k1, k2, k3, kb1, kb2, kb3 = jax.random.split(key, 8)

    x = jax.random.normal(kx, (num_nodes, in_channels), jnp.float32)
    edge_index = jax.random.randint(ke, (2, num_edges), 0, num_nodes, jnp.int32)
    a_hat = build_normalized_adjacency(edge_index, num_nodes)

    w1 = jax.random.normal(k1, (in_channels, hidden_channels), jnp.float32) * 0.1
    b1 = jax.random.normal(kb1, (1, hidden_channels), jnp.float32) * 0.1
    w2 = jax.random.normal(k2, (hidden_channels, half_hidden), jnp.float32) * 0.1
    b2 = jax.random.normal(kb2, (1, half_hidden), jnp.float32) * 0.1
    w3 = jax.random.normal(k3, (half_hidden, out_channels), jnp.float32) * 0.1
    b3 = jax.random.normal(kb3, (1, out_channels), jnp.float32) * 0.1

    ref = reference_forward(a_hat, x, w1, b1, w2, b2, w3, b3)

    # Path exercised at this graph size: single fully fused kernel.
    prep = prepare_gcn(a_hat, w1, b1, w2, b2, w3, b3)
    out = jax.block_until_ready(gcn_forward(prep, x))
    assert out.shape == (num_nodes, out_channels)
    # bf16 A_hat / bf16 MXU operands (f32 accumulation) -> slightly looser tol.
    assert jnp.allclose(out, ref, atol=2e-2, rtol=2e-2), (
        float(jnp.max(jnp.abs(out - ref))))

    # Smoke-test the large-graph tiled pipeline (both P-residency variants).
    for rp in (True, False):
        prep_t = prepare_gcn(a_hat, w1, b1, w2, b2, w3, b3,
                             force_tiled=True, resident_p=rp)
        out_t = jax.block_until_ready(gcn_forward(prep_t, x))
        assert out_t.shape == (num_nodes, out_channels)
        assert jnp.allclose(out_t, ref, atol=2e-2, rtol=2e-2), (
            float(jnp.max(jnp.abs(out_t - ref))))

    print("KERNEL_OK")
</pallas_src>

<mosaic_0001>
module attributes {stable_mosaic.version = 11 : i64} {
  func.func @_fused_kernel(%arg0: memref<256x256xbf16, #tpu.memory_space<vmem>>, %arg1: memref<256x128xf32, #tpu.memory_space<vmem>>, %arg2: memref<128x128xf32, #tpu.memory_space<vmem>>, %arg3: memref<1x128xf32, #tpu.memory_space<vmem>>, %arg4: memref<128x128xf32, #tpu.memory_space<vmem>>, %arg5: memref<1x128xf32, #tpu.memory_space<vmem>>, %arg6: memref<256x128xf32, #tpu.memory_space<vmem>>) attributes {dimension_semantics = [], scalar_prefetch = 0 : i64, scratch_operands = 0 : i64, tpu.core_type = #tpu.core_type<tc>} {
    %c0 = arith.constant 0 : index
    %c0_0 = arith.constant 0 : index
    %0 = vector.load %arg1[%c0, %c0_0] : memref<256x128xf32, #tpu.memory_space<vmem>>, vector<256x128xf32>
    %c0_1 = arith.constant 0 : index
    %c0_2 = arith.constant 0 : index
    %1 = vector.load %arg2[%c0_1, %c0_2] : memref<128x128xf32, #tpu.memory_space<vmem>>, vector<128x128xf32>
    %cst = arith.constant dense<0.000000e+00> : vector<256x128xf32>
    %2 = tpu.matmul %0, %1, %cst {dimension_numbers = #tpu.dot_dimension_numbers<[1], [0], [0], [1], [0, 0, 1, 1], [], []>} : vector<256x128xf32>, vector<128x128xf32>, vector<256x128xf32> -> vector<256x128xf32>
    %c0_3 = arith.constant 0 : index
    %c0_4 = arith.constant 0 : index
    %3 = vector.load %arg0[%c0_3, %c0_4] : memref<256x256xbf16, #tpu.memory_space<vmem>>, vector<256x256xbf16>
    %4 = arith.truncf %2 : vector<256x128xf32> to vector<256x128xbf16>
    %cst_5 = arith.constant dense<0.000000e+00> : vector<256x128xf32>
    %5 = tpu.matmul %3, %4, %cst_5 {dimension_numbers = #tpu.dot_dimension_numbers<[1], [0], [0], [1], [0, 0, 1, 1], [], []>} : vector<256x256xbf16>, vector<256x128xbf16>, vector<256x128xf32> -> vector<256x128xf32>
    %c0_6 = arith.constant 0 : index
    %c0_7 = arith.constant 0 : index
    %6 = vector.load %arg3[%c0_6, %c0_7] : memref<1x128xf32, #tpu.memory_space<vmem>>, vector<1x128xf32>
    %7 = vector.broadcast %6 : vector<1x128xf32> to vector<256x128xf32>
    %8 = arith.addf %5, %7 : vector<256x128xf32>
    %cst_8 = arith.constant 0.000000e+00 : f32
    %9 = vector.broadcast %cst_8 : f32 to vector<256x128xf32>
    %10 = arith.maximumf %8, %9 : vector<256x128xf32>
    %c0_9 = arith.constant 0 : index
    %c0_10 = arith.constant 0 : index
    %11 = vector.load %arg4[%c0_9, %c0_10] : memref<128x128xf32, #tpu.memory_space<vmem>>, vector<128x128xf32>
    %cst_11 = arith.constant dense<0.000000e+00> : vector<256x128xf32>
    %12 = tpu.matmul %10, %11, %cst_11 {dimension_numbers = #tpu.dot_dimension_numbers<[1], [0], [0], [1], [0, 0, 1, 1], [], []>} : vector<256x128xf32>, vector<128x128xf32>, vector<256x128xf32> -> vector<256x128xf32>
    %c0_12 = arith.constant 0 : index
    %c0_13 = arith.constant 0 : index
    %13 = vector.load %arg0[%c0_12, %c0_13] : memref<256x256xbf16, #tpu.memory_space<vmem>>, vector<256x256xbf16>
    %14 = arith.truncf %12 : vector<256x128xf32> to vector<256x128xbf16>
    %cst_14 = arith.constant dense<0.000000e+00> : vector<256x128xf32>
    %15 = tpu.matmul %13, %14, %cst_14 {dimension_numbers = #tpu.dot_dimension_numbers<[1], [0], [0], [1], [0, 0, 1, 1], [], []>} : vector<256x256xbf16>, vector<256x128xbf16>, vector<256x128xf32> -> vector<256x128xf32>
    %c0_15 = arith.constant 0 : index
    %c0_16 = arith.constant 0 : index
    %16 = vector.load %arg5[%c0_15, %c0_16] : memref<1x128xf32, #tpu.memory_space<vmem>>, vector<1x128xf32>
    %17 = vector.broadcast %16 : vector<1x128xf32> to vector<256x128xf32>
    %18 = arith.addf %15, %17 : vector<256x128xf32>
    %cst_17 = arith.constant dense<0xFF800000> : vector<256xf32>
    %19 = vector.multi_reduction <maximumf>, %18, %cst_17 [1] : vector<256x128xf32> to vector<256xf32>
    %20 = vector.shape_cast %19 : vector<256xf32> to vector<256x1xf32>
    %21 = vector.broadcast %20 : vector<256x1xf32> to vector<256x128xf32>
    %22 = arith.subf %18, %21 : vector<256x128xf32>
    %23 = math.exp %22 : vector<256x128xf32>
    %cst_18 = arith.constant dense<0.000000e+00> : vector<256xf32>
    %24 = vector.multi_reduction <add>, %23, %cst_18 [1] : vector<256x128xf32> to vector<256xf32>
    %25 = vector.shape_cast %24 : vector<256xf32> to vector<256x1xf32>
    %26 = math.log %25 : vector<256x1xf32>
    %27 = vector.broadcast %26 : vector<256x1xf32> to vector<256x128xf32>
    %28 = arith.subf %22, %27 : vector<256x128xf32>
    %c0_19 = arith.constant 0 : index
    %c0_20 = arith.constant 0 : index
    %29 = vector.load %arg6[%c0_19, %c0_20] : memref<256x128xf32, #tpu.memory_space<vmem>>, vector<256x128xf32>
    tpu.vector_store %arg6[%c0_19, %c0_20], %28 {strides = array<i32>} : memref<256x128xf32, #tpu.memory_space<vmem>>, vector<256x128xf32>,
    return
  }
}

</mosaic_0001>

<bundles_post_ra>
// kernel: tpu_custom_call.1
= control target key start
LH: loop header
LB: loop body
LE: loop exit
PB: predicated region body
PF: predicated region fallthrough
CT: control target
= control target key end

     0   :  { %11 = vsyncpa [#allocation3], 0  ;;  %s3025_s0 = inlined_call_operand.hbm [shape: bf16[256,256], index: 0, kind: input, shape index: {}]   ;;  %s3026_s1 = inlined_call_operand.hbm [shape: f32[256,128], index: 1, kind: input, shape index: {}]   ;;  %s3027_s2 = inlined_call_operand.hbm [shape: f32[128,128], index: 2, kind: input, shape index: {}]   ;;  %s3028_s3 = inlined_call_operand.vmem [shape: f32[1,128], index: 3, kind: input, shape index: {}]   ;;  %s3029_s4 = inlined_call_operand.hbm [shape: f32[128,128], index: 4, kind: input, shape index: {}]   ;;  %s3030_s5 = inlined_call_operand.vmem [shape: f32[1,128], index: 5, kind: input, shape index: {}]   ;;  %s3031_s6 = inlined_call_operand.hbm [shape: f32[256,128], index: 6, kind: output, shape index: {}]  }
   0x1   :  { %12 = vsyncpa [#allocation6], 0 }
   0x2   :  { %13 = vsyncpa [#allocation9], 0 }
   0x3   :  { %14 = vsyncpa [#allocation4], 0  ;;  %s2436_s21 = smov [#allocation5]   ;;  %s2437_s23 = smov [#allocation2]  }
   0x4   :  { %s32_s22 = sshll.u32 %s2436_s21, 4  ;;  %s20_s24 = sshll.u32 %s2437_s23, 4  ;;  %s33_s22 = int_to_ptr.vmem [resolvable:$true] %s32_s22  ;;  %s2478_s24 = int_to_ptr.vmem [resolvable:$true] %s20_s24 }
   0x5   :  { %s2318_s27 = scalar_lea.hbm %s3026_s1, 4096 }
   0x6   :  { %p2319_p0 = scmp.ne.s32.totalorder %s3026_s1, %s2318_s27  ;;  %p2322_p1 = scmp.lt.u32.totalorder %s2318_s27, %s3026_s1 }
   0x8   :  { %p2324_p2 = pnand %p2322_p1, %p2319_p0 }
   0xa   :  { %2327 = shalt.err (!%p2324_p2)
}
   0xb   :  { %s2328_s8 = scalar_lea.vmem %s33_s22, 4096  ;;  %p2333_p4 = scmp.lt.s32.totalorder %s33_s22, %s33_s22 }
   0xc   :  { %p2329_p3 = scmp.ne.s32.totalorder %s33_s22, %s2328_s8  ;;  %p2334_p5 = scmp.lt.s32.totalorder %s2328_s8, %s2328_s8 }
   0xe   :  { %p2335_p6 = por %p2334_p5, %p2333_p4 }
  0x10   :  { %p2336_p7 = pnand %p2335_p6, %p2329_p3 }
  0x12   :  { %2339 = shalt.err (!%p2336_p7)
}
  0x13   :  { %s2438_s9 = smov 128   ;;  %s2439_s10 = smov 8  }
  0x14   :  { %38 = dma.hbm_to_vmem [thread:$0]  %s3026_s1, 4096, %s33_s22, [#allocation6], %s2438_s9, %s2438_s9, %s2439_s10  }
  0x15   :  { %s2340_s15 = scalar_lea.hbm %s3025_s0, 4096 }
  0x16   :  { %p2341_p8 = scmp.ne.s32.totalorder %s3025_s0, %s2340_s15  ;;  %p2344_p9 = scmp.lt.u32.totalorder %s2340_s15, %s3025_s0 }
  0x18   :  { %p2346_p10 = pnand %p2344_p9, %p2341_p8 }
  0x1a   :  { %2349 = shalt.err (!%p2346_p10)
}
  0x1b   :  { %s2350_s20 = scalar_lea.vmem %s2478_s24, 4096  ;;  %p2355_p12 = scmp.lt.s32.totalorder %s2478_s24, %s2478_s24 }
  0x1c   :  { %p2351_p11 = scmp.ne.s32.totalorder %s2478_s24, %s2350_s20  ;;  %p2356_p13 = scmp.lt.s32.totalorder %s2350_s20, %s2350_s20 }
  0x1e   :  { %p2357_p0 = por %p2356_p13, %p2355_p12 }
  0x20   :  { %p2358_p1 = pnand %p2357_p0, %p2351_p11 }
  0x22   :  { %2361 = shalt.err (!%p2358_p1)
}
  0x23   :  { %26 = dma.hbm_to_vmem [thread:$0]  %s3025_s0, 4096, %s2478_s24, [#allocation3], %s2438_s9, %s2438_s9, %s2439_s10  }
  0x24   :  { %s2440_s22 = smov [#allocation7]   ;;  %s2441_s25 = smov [#allocation8]  }
  0x25   :  { %s44_s23 = sshll.u32 %s2440_s22, 4  ;;  %s58_s26 = sshll.u32 %s2441_s25, 4  ;;  %s45_s23 = int_to_ptr.vmem [resolvable:$true] %s44_s23  ;;  %s2515_s26 = int_to_ptr.vmem [resolvable:$true] %s58_s26 }
  0x26   :  { %s2362_s29 = scalar_lea.hbm %s3027_s2, 2048 }
  0x27   :  { %p2363_p2 = scmp.ne.s32.totalorder %s3027_s2, %s2362_s29  ;;  %p2366_p3 = scmp.lt.u32.totalorder %s2362_s29, %s3027_s2 }
  0x29   :  { %p2368_p4 = pnand %p2366_p3, %p2363_p2 }
  0x2b   :  { %2371 = shalt.err (!%p2368_p4)
}
  0x2c   :  { %s2372_s0 = scalar_lea.vmem %s45_s23, 2048  ;;  %p2377_p6 = scmp.lt.s32.totalorder %s45_s23, %s45_s23 }
  0x2d   :  { %p2373_p5 = scmp.ne.s32.totalorder %s45_s23, %s2372_s0  ;;  %p2378_p7 = scmp.lt.s32.totalorder %s2372_s0, %s2372_s0 }
  0x2f   :  { %p2379_p8 = por %p2378_p7, %p2377_p6 }
  0x31   :  { %p2380_p9 = pnand %p2379_p8, %p2373_p5 }
  0x33   :  { %2383 = shalt.err (!%p2380_p9)
}
  0x34   :  { %50 = dma.hbm_to_vmem [thread:$0]  %s3027_s2, 2048, %s45_s23, [#allocation6], %s2438_s9, %s2438_s9, %s2439_s10  }
  0x35   :  { %s2384_s15 = scalar_lea.hbm %s3029_s4, 2048 }
  0x36   :  { %p2385_p10 = scmp.ne.s32.totalorder %s3029_s4, %s2384_s15  ;;  %p2388_p11 = scmp.lt.u32.totalorder %s2384_s15, %s3029_s4 }
  0x38   :  { %p2390_p12 = pnand %p2388_p11, %p2385_p10 }
  0x3a   :  { %2393 = shalt.err (!%p2390_p12)
}
  0x3b   :  { %s2394_s20 = scalar_lea.vmem %s2515_s26, 2048  ;;  %p2399_p0 = scmp.lt.s32.totalorder %s2515_s26, %s2515_s26 }
  0x3c   :  { %p2395_p13 = scmp.ne.s32.totalorder %s2515_s26, %s2394_s20  ;;  %p2400_p1 = scmp.lt.s32.totalorder %s2394_s20, %s2394_s20 }
  0x3e   :  { %p2401_p2 = por %p2400_p1, %p2399_p0 }
  0x40   :  { %p2402_p3 = pnand %p2401_p2, %p2395_p13 }
  0x42   :  { %2405 = shalt.err (!%p2402_p3)
}
  0x43   :  { %64 = dma.hbm_to_vmem [thread:$0]  %s3029_s4, 2048, %s2515_s26, [#allocation9], %s2438_s9, %s2438_s9, %s2439_s10  }
  0x44   :  { %2428 = dma.done.wait [#allocation3], 4096  }
  0x45   :  { %2429 = vsyncadd [#allocation3], 4294963200 }
  0x46   :  { %2430 = dma.done.wait [#allocation6], 6144  }
  0x47   :  { %2431 = vsyncadd [#allocation6], 4294961152 }
  0x48   :  { %2432 = dma.done.wait [#allocation9], 2048  }
  0x49   :  { %2433 = vsyncadd [#allocation9], 4294965248  ;;  %v112_v0 = vld [vmem:[#allocation7] sm:$0xff]  ;;  %v113_v1 = vld [vmem:[#allocation7 + $0x8] sm:$0xff] }
  0x4a   :  { %v114_v2 = vld [vmem:[#allocation7 + $0x10] sm:$0xff]  ;;  %v2071_v3 = vpack.c.bf16 %v113_v1, %v112_v0  ;;  %v115_v4 = vld [vmem:[#allocation7 + $0x18] sm:$0xff]  ;;  %v116_v6 = vld [vmem:[#allocation7 + $0x20] sm:$0xff] }
  0x4b   :  { %v2075_v5 = vpack.c.bf16 %v115_v4, %v114_v2  ;;  %v117_v7 = vld [vmem:[#allocation7 + $0x28] sm:$0xff]  ;;  %v80_v9 = vld [vmem:[#allocation5] sm:$0xff]  ;;  %v118_v10 = vld [vmem:[#allocation7 + $0x30] sm:$0xff] }
  0x4c   :  { %2072 = vmatprep.subr.bf16.mxu1 %v2071_v3  ;;  %v2079_v8 = vpack.c.bf16 %v117_v7, %v116_v6  ;;  %v119_v11 = vld [vmem:[#allocation7 + $0x38] sm:$0xff]  ;;  %1943 = vmatprep.mubr.f32.mxu1 %v80_v9  ;;  %v120_v13 = vld [vmem:[#allocation7 + $0x40] sm:$0xff]  ;;  %v121_v14 = vld [vmem:[#allocation7 + $0x48] sm:$0xff] }
  0x4d   :  { %2074 = vmatpush3.bf16.msra.mxu1 %v2071_v3  ;;  %v2083_v12 = vpack.c.bf16 %v119_v11, %v118_v10  ;;  %v2087_v15 = vpack.c.bf16 %v121_v14, %v120_v13  ;;  %v122_v16 = vld [vmem:[#allocation7 + $0x50] sm:$0xff]  ;;  %v123_v17 = vld [vmem:[#allocation7 + $0x58] sm:$0xff]  ;;  %v124_v18 = vld [vmem:[#allocation7 + $0x60] sm:$0xff] }
  0x4e   :  { %2076 = vmatprep.subr.bf16.mxu1 %v2075_v5  ;;  %v125_v19 = vld [vmem:[#allocation7 + $0x68] sm:$0xff]  ;;  %v2091_v20 = vpack.c.bf16 %v123_v17, %v122_v16  ;;  %v126_v21 = vld [vmem:[#allocation7 + $0x70] sm:$0xff]  ;;  %v127_v22 = vld [vmem:[#allocation7 + $0x78] sm:$0xff] }
  0x4f   :  { %v2095_v23 = vpack.c.bf16 %v125_v19, %v124_v18  ;;  %v2099_v24 = vpack.c.bf16 %v127_v22, %v126_v21  ;;  %v81_v25 = vld [vmem:[#allocation5 + $0x8] sm:$0xff]  ;;  %v82_v26 = vld [vmem:[#allocation5 + $0x10] sm:$0xff]  ;;  %v83_v27 = vld [vmem:[#allocation5 + $0x18] sm:$0xff] }
  0x50   :  { %v84_v28 = vld [vmem:[#allocation5 + $0x20] sm:$0xff]  ;;  %v85_v29 = vld [vmem:[#allocation5 + $0x28] sm:$0xff]  ;;  %v86_v30 = vld [vmem:[#allocation5 + $0x30] sm:$0xff] }
  0x51   :  { %2078 = vmatpush3.bf16.msra.mxu1 %v2075_v5  ;;  %v87_v31 = vld [vmem:[#allocation5 + $0x38] sm:$0xff]  ;;  %v88_v32 = vld [vmem:[#allocation5 + $0x40] sm:$0xff]  ;;  %v89_v33 = vld [vmem:[#allocation5 + $0x48] sm:$0xff] }
  0x52   :  { %2080 = vmatprep.subr.bf16.mxu1 %v2079_v8  ;;  %v90_v34 = vld [vmem:[#allocation5 + $0x50] sm:$0xff]  ;;  %v91_v35 = vld [vmem:[#allocation5 + $0x58] sm:$0xff]  ;;  %v92_v36 = vld [vmem:[#allocation5 + $0x60] sm:$0xff] }
  0x53   :  { %v93_v37 = vld [vmem:[#allocation5 + $0x68] sm:$0xff]  ;;  %v94_v38 = vld [vmem:[#allocation5 + $0x70] sm:$0xff]  ;;  %v95_v39 = vld [vmem:[#allocation5 + $0x78] sm:$0xff] }
  0x54   :  { %v96_v40 = vld [vmem:[#allocation5 + $0x80] sm:$0xff]  ;;  %v97_v41 = vld [vmem:[#allocation5 + $0x88] sm:$0xff]  ;;  %v98_v42 = vld [vmem:[#allocation5 + $0x90] sm:$0xff] }
  0x55   :  { %2082 = vmatpush3.bf16.msra.mxu1 %v2079_v8  ;;  %v99_v43 = vld [vmem:[#allocation5 + $0x98] sm:$0xff]  ;;  %v100_v44 = vld [vmem:[#allocation5 + $0xa0] sm:$0xff]  ;;  %v101_v45 = vld [vmem:[#allocation5 + $0xa8] sm:$0xff] }
  0x56   :  { %2084 = vmatprep.subr.bf16.mxu1 %v2083_v12  ;;  %v102_v46 = vld [vmem:[#allocation5 + $0xb0] sm:$0xff]  ;;  %v103_v47 = vld [vmem:[#allocation5 + $0xb8] sm:$0xff]  ;;  %v104_v48 = vld [vmem:[#allocation5 + $0xc0] sm:$0xff] }
  0x57   :  { %v105_v49 = vld [vmem:[#allocation5 + $0xc8] sm:$0xff]  ;;  %v106_v50 = vld [vmem:[#allocation5 + $0xd0] sm:$0xff]  ;;  %v107_v51 = vld [vmem:[#allocation5 + $0xd8] sm:$0xff] }
  0x58   :  { %v108_v52 = vld [vmem:[#allocation5 + $0xe0] sm:$0xff]  ;;  %v109_v53 = vld [vmem:[#allocation5 + $0xe8] sm:$0xff]  ;;  %v110_v54 = vld [vmem:[#allocation5 + $0xf0] sm:$0xff] }
  0x59   :  { %2086 = vmatpush3.bf16.msra.mxu1 %v2083_v12  ;;  %v111_v55 = vld [vmem:[#allocation5 + $0xf8] sm:$0xff]  ;;  %v2552_v56 = vld [vmem:[#allocation2 + $0x4] ss:$8 sps:$4 sm:$0xff]  }
  0x5a   :  { %2088 = vmatprep.subr.bf16.mxu1 %v2087_v15 }
  0x5d   :  { %2090 = vmatpush3.bf16.msra.mxu1 %v2087_v15 }
  0x5e   :  { %2092 = vmatprep.subr.bf16.mxu1 %v2091_v20 }
  0x61   :  { %2094 = vmatpush3.bf16.msra.mxu1 %v2091_v20 }
  0x62   :  { %2096 = vmatprep.subr.bf16.mxu1 %v2095_v23 }
  0x65   :  { %2098 = vmatpush3.bf16.msra.mxu1 %v2095_v23 }
  0x66   :  { %2100 = vmatprep.subr.bf16.mxu1 %v2099_v24 }
  0x69   :  { %2102 = vmatpush3.bf16.msra.mxu1 %v2099_v24 }
  0x6c   :  { %1944 = vmatmul.mubr.f32.vlgmr.msra.gmra.mrb[0].mxu1 %v81_v25 }
  0x6d   :  { %1946 = vmatprep.mubr.f32.mxu1 %v82_v26 }
  0x70   :  { %1947 = vmatmul.mubr.f32.gmra.mrb[2].mxu1 %v83_v27 }
  0x71   :  { %1949 = vmatprep.mubr.f32.mxu1 %v84_v28 }
  0x74   :  { %1950 = vmatmul.mubr.f32.gmra.mrb[4].mxu1 %v85_v29 }
  0x75   :  { %1952 = vmatprep.mubr.f32.mxu1 %v86_v30 }
  0x78   :  { %1953 = vmatmul.mubr.f32.gmra.mrb[6].mxu1 %v87_v31 }
  0x79   :  { %1955 = vmatprep.mubr.f32.mxu1 %v88_v32 }
  0x7c   :  { %1956 = vmatmul.mubr.f32.gmra.mrb[8].mxu1 %v89_v33 }
  0x7d   :  { %1958 = vmatprep.mubr.f32.mxu1 %v90_v34 }
  0x80   :  { %1959 = vmatmul.mubr.f32.gmra.mrb[10].mxu1 %v91_v35 }
  0x81   :  { %1961 = vmatprep.mubr.f32.mxu1 %v92_v36 }
  0x84   :  { %1962 = vmatmul.mubr.f32.gmra.mrb[12].mxu1 %v93_v37 }
  0x85   :  { %1964 = vmatprep.mubr.f32.mxu1 %v94_v38 }
  0x88   :  { %1965 = vmatmul.mubr.f32.gmra.mrb[14].mxu1 %v95_v39  ;;  %v761_v39 = vld [vmem:[#allocation8] sm:$0xff] }
  0x89   :  { %1967 = vmatprep.mubr.f32.mxu1 %v96_v40  ;;  %v762_v40 = vld [vmem:[#allocation8 + $0x8] sm:$0xff] }
  0x8c   :  { %1968 = vmatmul.mubr.f32.gmra.mrb[16].mxu1 %v97_v41  ;;  %v763_v41 = vld [vmem:[#allocation8 + $0x10] sm:$0xff] }
  0x8d   :  { %1970 = vmatprep.mubr.f32.mxu1 %v98_v42 }
  0x90   :  { %1971 = vmatmul.mubr.f32.gmra.mrb[18].mxu1 %v99_v43  ;;  %v2103_v43 = vpack.c.bf16 %v762_v40, %v761_v39 }
  0x91   :  { %1973 = vmatprep.mubr.f32.mxu1 %v100_v44  ;;  %v764_v44 = vld [vmem:[#allocation8 + $0x18] sm:$0xff] }
  0x92   :  { %2104 = vmatprep.subr.bf16.mxu0 %v2103_v43 }
  0x93   :  { %2106 = vmatpush3.bf16.msra.mxu0 %v2103_v43 }
  0x94   :  { %1974 = vmatmul.mubr.f32.gmra.mrb[20].mxu1 %v101_v45 }
  0x95   :  { %1976 = vmatprep.mubr.f32.mxu1 %v102_v46  ;;  %v2107_v46 = vpack.c.bf16 %v764_v44, %v763_v41 }
  0x97   :  { %2108 = vmatprep.subr.bf16.mxu0 %v2107_v46 }
  0x98   :  { %1977 = vmatmul.mubr.f32.gmra.mrb[22].mxu1 %v103_v47  ;;  %v765_v47 = vld [vmem:[#allocation8 + $0x20] sm:$0xff]  ;;  %2110 = vmatpush3.bf16.msra.mxu0 %v2107_v46 }
  0x99   :  { %1979 = vmatprep.mubr.f32.mxu1 %v104_v48  ;;  %v766_v48 = vld [vmem:[#allocation8 + $0x28] sm:$0xff] }
  0x9c   :  { %1980 = vmatmul.mubr.f32.gmra.mrb[24].mxu1 %v105_v49  ;;  %v2555_v49 = vld [vmem:[#allocation2] ss:$8 sps:$4 sm:$0xff]  }
  0x9d   :  { %1982 = vmatprep.mubr.f32.mxu1 %v106_v50  ;;  %v2557_v50 = vld [vmem:[#allocation2 + $0x14] ss:$8 sps:$4 sm:$0xff]  }
  0xa0   :  { %1983 = vmatmul.mubr.f32.gmra.mrb[26].mxu1 %v107_v51  ;;  %v2111_v51 = vpack.c.bf16 %v766_v48, %v765_v47 }
  0xa1   :  { %1985 = vmatprep.mubr.f32.mxu1 %v108_v52  ;;  %v767_v52 = vld [vmem:[#allocation8 + $0x30] sm:$0xff] }
  0xa2   :  { %2112 = vmatprep.subr.bf16.mxu0 %v2111_v51 }
  0xa3   :  { %2114 = vmatpush3.bf16.msra.mxu0 %v2111_v51 }
  0xa4   :  { %1986 = vmatmul.mubr.f32.gmra.mrb[28].mxu1 %v109_v53  ;;  %v768_v53 = vld [vmem:[#allocation8 + $0x38] sm:$0xff] }
  0xa5   :  { %1988 = vmatprep.mubr.f32.mxu1 %v110_v54  ;;  %v2115_v54 = vpack.c.bf16 %v768_v53, %v767_v52 }
  0xa7   :  { %2116 = vmatprep.subr.bf16.mxu0 %v2115_v54 }
  0xa8   :  { %1989 = vmatmul.mubr.f32.gmra.mrb[30].mxu1 %v111_v55  ;;  %v769_v55 = vld [vmem:[#allocation8 + $0x40] sm:$0xff]  ;;  %2118 = vmatpush3.bf16.msra.mxu0 %v2115_v54 }
  0xa9   :  { %600 = vmatprep.mubr.bf16.mxu1 %v2552_v56 }
 0x13f   :  { %v1945_v57 = vpop.f32.mrb[0].mxu1 }
 0x140   :  { %v194_v58 = vpop.f32.mrb[1].mxu1 }
 0x141   :  { %v385_v59 = vpack.c.bf16 %v1945_v57, %v194_v58  ;;  %v770_v57 = vld [vmem:[#allocation8 + $0x48] sm:$0xff]  ;;  %v2561_v58 = vld [vmem:[#allocation2 + $0x10] ss:$8 sps:$4 sm:$0xff]  }
 0x143   :  { %v1948_v60 = vpop.f32.mrb[2].mxu1 }
 0x144   :  { %v204_v61 = vpop.f32.mrb[3].mxu1 }
 0x145   :  { %v386_v62 = vpack.c.bf16 %v1948_v60, %v204_v61  ;;  %v2119_v60 = vpack.c.bf16 %v770_v57, %v769_v55  ;;  %v771_v61 = vld [vmem:[#allocation8 + $0x50] sm:$0xff] }
 0x147   :  { %v1951_v63 = vpop.f32.mrb[4].mxu1  ;;  %2120 = vmatprep.subr.bf16.mxu0 %v2119_v60 }
 0x148   :  { %v214_v0 = vpop.f32.mrb[5].mxu1  ;;  %2122 = vmatpush3.bf16.msra.mxu0 %v2119_v60 }
 0x149   :  { %v387_v1 = vpack.c.bf16 %v1951_v63, %v214_v0  ;;  %v2567_v0 = vld [vmem:[#allocation2 + $0x20] ss:$8 sps:$4 sm:$0xff]  }
 0x14b   :  { %v1954_v2 = vpop.f32.mrb[6].mxu1 }
 0x14c   :  { %v224_v3 = vpop.f32.mrb[7].mxu1 }
 0x14d   :  { %v388_v4 = vpack.c.bf16 %v1954_v2, %v224_v3  ;;  %v2573_v2 = vld [vmem:[#allocation2 + $0x30] ss:$8 sps:$4 sm:$0xff]   ;;  %v2575_v3 = vld [vmem:[#allocation2 + $0x44] ss:$8 sps:$4 sm:$0xff]  }
 0x14f   :  { %v1957_v5 = vpop.f32.mrb[8].mxu1 }
 0x150   :  { %v234_v6 = vpop.f32.mrb[9].mxu1 }
 0x151   :  { %v389_v7 = vpack.c.bf16 %v1957_v5, %v234_v6  ;;  %v2581_v5 = vld [vmem:[#allocation2 + $0x54] ss:$8 sps:$4 sm:$0xff]   ;;  %v2585_v6 = vld [vmem:[#allocation2 + $0x50] ss:$8 sps:$4 sm:$0xff]  }
 0x153   :  { %v1960_v8 = vpop.f32.mrb[10].mxu1 }
 0x154   :  { %v244_v9 = vpop.f32.mrb[11].mxu1 }
 0x155   :  { %v390_v10 = vpack.c.bf16 %v1960_v8, %v244_v9  ;;  %v2591_v8 = vld [vmem:[#allocation2 + $0x60] ss:$8 sps:$4 sm:$0xff]   ;;  %v2593_v9 = vld [vmem:[#allocation2 + $0x74] ss:$8 sps:$4 sm:$0xff]  }
 0x157   :  { %v1963_v11 = vpop.f32.mrb[12].mxu1 }
 0x158   :  { %v254_v12 = vpop.f32.mrb[13].mxu1 }
 0x159   :  { %v391_v13 = vpack.c.bf16 %v1963_v11, %v254_v12  ;;  %v2599_v11 = vld [vmem:[#allocation2 + $0x84] ss:$8 sps:$4 sm:$0xff]   ;;  %v2603_v12 = vld [vmem:[#allocation2 + $0x80] ss:$8 sps:$4 sm:$0xff]  }
 0x15b   :  { %v1966_v14 = vpop.f32.mrb[14].mxu1 }
 0x15c   :  { %v264_v15 = vpop.f32.mrb[15].mxu1 }
 0x15d   :  { %v392_v16 = vpack.c.bf16 %v1966_v14, %v264_v15  ;;  %v2609_v14 = vld [vmem:[#allocation2 + $0x90] ss:$8 sps:$4 sm:$0xff]   ;;  %v2611_v15 = vld [vmem:[#allocation2 + $0xa4] ss:$8 sps:$4 sm:$0xff]  }
 0x15f   :  { %v1969_v17 = vpop.f32.mrb[16].mxu1 }
 0x160   :  { %v274_v18 = vpop.f32.mrb[17].mxu1 }
 0x161   :  { %v393_v19 = vpack.c.bf16 %v1969_v17, %v274_v18  ;;  %v2617_v17 = vld [vmem:[#allocation2 + $0xb4] ss:$8 sps:$4 sm:$0xff]   ;;  %v773_v18 = vld [vmem:[#allocation8 + $0x60] sm:$0xff] }
 0x163   :  { %v1972_v20 = vpop.f32.mrb[18].mxu1  ;;  %1639 = vmatprep.subr.bf16.mxu1 %v393_v19  ;;  %v774_v19 = vld [vmem:[#allocation8 + $0x68] sm:$0xff] }
 0x164   :  { %v284_v21 = vpop.f32.mrb[19].mxu1  ;;  %1640 = vmatpush3.bf16.msra.mxu1 %v385_v59  ;;  %v2563_v59 = vld [vmem:[#allocation2 + $0x24] ss:$8 sps:$4 sm:$0xff]  }
 0x165   :  { %v394_v22 = vpack.c.bf16 %v1972_v20, %v284_v21  ;;  %v2127_v20 = vpack.c.bf16 %v774_v19, %v773_v18  ;;  %v2621_v21 = vld [vmem:[#allocation2 + $0xb0] ss:$8 sps:$4 sm:$0xff]  }
 0x167   :  { %v1975_v23 = vpop.f32.mrb[20].mxu1  ;;  %1641 = vmatprep.subr.bf16.mxu1 %v394_v22  ;;  %v2623_v22 = vld [vmem:[#allocation2 + $0xc4] ss:$8 sps:$4 sm:$0xff]  }
 0x168   :  { %v294_v24 = vpop.f32.mrb[21].mxu1  ;;  %1642 = vmatpush3.bf16.msra.mxu1 %v386_v62  ;;  %v772_v62 = vld [vmem:[#allocation8 + $0x58] sm:$0xff] }
 0x169   :  { %v395_v25 = vpack.c.bf16 %v1975_v23, %v294_v24  ;;  %v2123_v63 = vpack.c.bf16 %v772_v62, %v771_v61  ;;  %v775_v23 = vld [vmem:[#allocation8 + $0x70] sm:$0xff]  ;;  %v776_v24 = vld [vmem:[#allocation8 + $0x78] sm:$0xff] }
 0x16b   :  { %v1978_v26 = vpop.f32.mrb[22].mxu1  ;;  %1643 = vmatprep.subr.bf16.mxu1 %v395_v25  ;;  %2124 = vmatprep.subr.bf16.mxu0 %v2123_v63  ;;  %v2131_v25 = vpack.c.bf16 %v776_v24, %v775_v23 }
 0x16c   :  { %v304_v27 = vpop.f32.mrb[23].mxu1  ;;  %1644 = vmatpush3.bf16.msra.mxu1 %v387_v1  ;;  %v2569_v1 = vld [vmem:[#allocation2 + $0x34] ss:$8 sps:$4 sm:$0xff]   ;;  %2126 = vmatpush3.bf16.msra.mxu0 %v2123_v63 }
 0x16d   :  { %v396_v28 = vpack.c.bf16 %v1978_v26, %v304_v27  ;;  %2128 = vmatprep.subr.bf16.mxu0 %v2127_v20  ;;  %v2627_v26 = vld [vmem:[#allocation2 + $0xc0] ss:$8 sps:$4 sm:$0xff]   ;;  %v2629_v27 = vld [vmem:[#allocation2 + $0xd4] ss:$8 sps:$4 sm:$0xff]  }
 0x16f   :  { %v1981_v29 = vpop.f32.mrb[24].mxu1  ;;  %1645 = vmatprep.subr.bf16.mxu1 %v396_v28  ;;  %v2633_v28 = vld [vmem:[#allocation2 + $0xd0] ss:$8 sps:$4 sm:$0xff]  }
 0x170   :  { %v314_v30 = vpop.f32.mrb[25].mxu1  ;;  %1646 = vmatpush3.bf16.msra.mxu1 %v388_v4  ;;  %v2579_v4 = vld [vmem:[#allocation2 + $0x40] ss:$8 sps:$4 sm:$0xff]   ;;  %2130 = vmatpush3.bf16.msra.mxu0 %v2127_v20 }
 0x171   :  { %v397_v31 = vpack.c.bf16 %v1981_v29, %v314_v30  ;;  %2132 = vmatprep.subr.bf16.mxu0 %v2131_v25  ;;  %v2635_v29 = vld [vmem:[#allocation2 + $0xe4] ss:$8 sps:$4 sm:$0xff]   ;;  %v2639_v30 = vld [vmem:[#allocation2 + $0xe0] ss:$8 sps:$4 sm:$0xff]  }
 0x173   :  { %v1984_v32 = vpop.f32.mrb[26].mxu1  ;;  %1647 = vmatprep.subr.bf16.mxu1 %v397_v31  ;;  %v2641_v31 = vld [vmem:[#allocation2 + $0xf4] ss:$8 sps:$4 sm:$0xff]  }
 0x174   :  { %v324_v33 = vpop.f32.mrb[27].mxu1  ;;  %1648 = vmatpush3.bf16.msra.mxu1 %v389_v7  ;;  %v2587_v7 = vld [vmem:[#allocation2 + $0x64] ss:$8 sps:$4 sm:$0xff]   ;;  %2134 = vmatpush3.bf16.msra.mxu0 %v2131_v25 }
 0x175   :  { %v398_v34 = vpack.c.bf16 %v1984_v32, %v324_v33  ;;  %v2645_v32 = vld [vmem:[#allocation2 + $0xf0] ss:$8 sps:$4 sm:$0xff]  }
 0x177   :  { %v1987_v35 = vpop.f32.mrb[28].mxu1  ;;  %1649 = vmatprep.subr.bf16.mxu1 %v398_v34 }
 0x178   :  { %v334_v36 = vpop.f32.mrb[29].mxu1  ;;  %1650 = vmatpush3.bf16.msra.mxu1 %v390_v10  ;;  %v2597_v10 = vld [vmem:[#allocation2 + $0x70] ss:$8 sps:$4 sm:$0xff]  }
 0x179   :  { %v399_v37 = vpack.c.bf16 %v1987_v35, %v334_v36  ;;  %v2651_v35 = vld [vmem:[%s3028_s3] ss:$0 sm:$0xff] }
 0x17b   :  { %v1990_v38 = vpop.f32.mrb[30].mxu1  ;;  %1651 = vmatprep.subr.bf16.mxu1 %v399_v37 }
 0x17c   :  { %v344_v42 = vpop.f32.mrb[31].mxu1  ;;  %1652 = vmatpush3.bf16.msra.mxu1 %v391_v13  ;;  %v2605_v13 = vld [vmem:[#allocation2 + $0x94] ss:$8 sps:$4 sm:$0xff]  }
 0x17d   :  { %v400_v45 = vpack.c.bf16 %v1990_v38, %v344_v42 }
 0x17f   :  { %1653 = vmatprep.subr.bf16.mxu1 %v400_v45 }
 0x180   :  { %1654 = vmatpush3.bf16.msra.mxu1 %v392_v16  ;;  %v2615_v16 = vld [vmem:[#allocation2 + $0xa0] ss:$8 sps:$4 sm:$0xff]  }
 0x183   :  { %601 = vmatmul.mubr.bf16.vlgmr.msra.gmra.mrb[32].mxu1 %v2555_v49 }
 0x184   :  { %608 = vmatprep.mubr.bf16.mxu1 %v2557_v50 }
 0x18b   :  { %609 = vmatmul.mubr.bf16.gmra.mrb[36].mxu1 %v2561_v58 }
 0x18c   :  { %616 = vmatprep.mubr.bf16.mxu1 %v2563_v59 }
 0x193   :  { %617 = vmatmul.mubr.bf16.gmra.mrb[40].mxu1 %v2567_v0 }
 0x194   :  { %624 = vmatprep.mubr.bf16.mxu1 %v2569_v1 }
 0x19b   :  { %625 = vmatmul.mubr.bf16.gmra.mrb[44].mxu1 %v2573_v2 }
 0x19c   :  { %632 = vmatprep.mubr.bf16.mxu1 %v2575_v3 }
 0x1a3   :  { %633 = vmatmul.mubr.bf16.gmra.mrb[48].mxu1 %v2579_v4 }
 0x1a4   :  { %640 = vmatprep.mubr.bf16.mxu1 %v2581_v5 }
 0x1ab   :  { %641 = vmatmul.mubr.bf16.gmra.mrb[52].mxu1 %v2585_v6 }
 0x1ac   :  { %648 = vmatprep.mubr.bf16.mxu1 %v2587_v7 }
 0x1b3   :  { %649 = vmatmul.mubr.bf16.gmra.mrb[56].mxu1 %v2591_v8 }
 0x1b4   :  { %656 = vmatprep.mubr.bf16.mxu1 %v2593_v9 }
 0x1bb   :  { %657 = vmatmul.mubr.bf16.gmra.mrb[60].mxu1 %v2597_v10 }
 0x1bc   :  { %664 = vmatprep.mubr.bf16.mxu1 %v2599_v11 }
 0x1c3   :  { %665 = vmatmul.mubr.bf16.gmra.mrb[64].mxu1 %v2603_v12 }
 0x1c4   :  { %672 = vmatprep.mubr.bf16.mxu1 %v2605_v13 }
 0x1cb   :  { %673 = vmatmul.mubr.bf16.gmra.mrb[68].mxu1 %v2609_v14 }
 0x1cc   :  { %680 = vmatprep.mubr.bf16.mxu1 %v2611_v15 }
 0x1d3   :  { %681 = vmatmul.mubr.bf16.gmra.mrb[72].mxu1 %v2615_v16 }
 0x1d4   :  { %688 = vmatprep.mubr.bf16.mxu1 %v2617_v17 }
 0x1db   :  { %689 = vmatmul.mubr.bf16.gmra.mrb[76].mxu1 %v2621_v21 }
 0x1dc   :  { %696 = vmatprep.mubr.bf16.mxu1 %v2623_v22 }
 0x1e3   :  { %697 = vmatmul.mubr.bf16.gmra.mrb[80].mxu1 %v2627_v26 }
 0x1e4   :  { %704 = vmatprep.mubr.bf16.mxu1 %v2629_v27 }
 0x1eb   :  { %705 = vmatmul.mubr.bf16.gmra.mrb[84].mxu1 %v2633_v28 }
 0x1ec   :  { %712 = vmatprep.mubr.bf16.mxu1 %v2635_v29 }
 0x1f3   :  { %713 = vmatmul.mubr.bf16.gmra.mrb[88].mxu1 %v2639_v30 }
 0x1f4   :  { %720 = vmatprep.mubr.bf16.mxu1 %v2641_v31 }
 0x1fb   :  { %721 = vmatmul.mubr.bf16.gmra.mrb[92].mxu1 %v2645_v32 }
 0x256   :  { %v1655_v33 = vpop.f32.mrb[32].mxu1 }
 0x257   :  { %v1656_v34 = vpop.f32.mrb[33].mxu1 }
 0x258   :  { %v1657_v36 = vadd.f32 %v1656_v34, %v1655_v33  ;;  %v1658_v37 = vpop.f32.mrb[34].mxu1 }
 0x259   :  { %v1659_v38 = vpop.f32.mrb[35].mxu1 }
 0x25a   :  { %v1660_v39 = vadd.f32 %v1659_v38, %v1658_v37  ;;  %v603_v40 = vadd.f32 %v1657_v36, %v2651_v35 }
 0x25c   :  { %v606_v41 = vadd.f32 %v1660_v39, %v2651_v35  ;;  %v729_v42 = vmax.f32 %v603_v40, 0.0 }
 0x25e   :  { %v730_v43 = vmax.f32 %v606_v41, 0.0  ;;  %v1661_v44 = vpop.f32.mrb[36].mxu1  ;;  %2023 = vmatprep.mubr.f32.mxu0 %v729_v42 }
 0x25f   :  { %v1662_v45 = vpop.f32.mrb[37].mxu1 }
 0x260   :  { %v1663_v46 = vadd.f32 %v1662_v45, %v1661_v44  ;;  %v1664_v47 = vpop.f32.mrb[38].mxu1  ;;  %2024 = vmatmul.mubr.f32.vlgmr.msra.gmra.mrb[0].mxu0 %v730_v43 }
 0x261   :  { %v1665_v48 = vpop.f32.mrb[39].mxu1 }
 0x262   :  { %v611_v51 = vadd.f32 %v1663_v46, %v2651_v35  ;;  %v1666_v52 = vadd.f32 %v1665_v48, %v1664_v47 }
 0x264   :  { %v731_v53 = vmax.f32 %v611_v51, 0.0  ;;  %v614_v54 = vadd.f32 %v1666_v52, %v2651_v35 }
 0x266   :  { %v732_v55 = vmax.f32 %v614_v54, 0.0  ;;  %v1667_v57 = vpop.f32.mrb[40].mxu1  ;;  %2026 = vmatprep.mubr.f32.mxu0 %v731_v53 }
 0x267   :  { %v1668_v60 = vpop.f32.mrb[41].mxu1 }
 0x268   :  { %v1669_v61 = vadd.f32 %v1668_v60, %v1667_v57  ;;  %v1670_v62 = vpop.f32.mrb[42].mxu1  ;;  %2027 = vmatmul.mubr.f32.gmra.mrb[2].mxu0 %v732_v55 }
 0x269   :  { %v1671_v63 = vpop.f32.mrb[43].mxu1 }
 0x26a   :  { %v619_v18 = vadd.f32 %v1669_v61, %v2651_v35  ;;  %v1672_v19 = vadd.f32 %v1671_v63, %v1670_v62 }
 0x26c   :  { %v733_v20 = vmax.f32 %v619_v18, 0.0  ;;  %v622_v23 = vadd.f32 %v1672_v19, %v2651_v35 }
 0x26e   :  { %v734_v24 = vmax.f32 %v622_v23, 0.0  ;;  %v1673_v25 = vpop.f32.mrb[44].mxu1  ;;  %2029 = vmatprep.mubr.f32.mxu0 %v733_v20 }
 0x26f   :  { %v1674_v33 = vpop.f32.mrb[45].mxu1 }
 0x270   :  { %v1675_v34 = vadd.f32 %v1674_v33, %v1673_v25  ;;  %v1676_v36 = vpop.f32.mrb[46].mxu1  ;;  %2030 = vmatmul.mubr.f32.gmra.mrb[4].mxu0 %v734_v24 }
 0x271   :  { %v1677_v37 = vpop.f32.mrb[47].mxu1 }
 0x272   :  { %v627_v38 = vadd.f32 %v1675_v34, %v2651_v35  ;;  %v1678_v39 = vadd.f32 %v1677_v37, %v1676_v36 }
 0x274   :  { %v735_v40 = vmax.f32 %v627_v38, 0.0  ;;  %v630_v41 = vadd.f32 %v1678_v39, %v2651_v35 }
 0x276   :  { %v736_v42 = vmax.f32 %v630_v41, 0.0  ;;  %v1679_v43 = vpop.f32.mrb[48].mxu1  ;;  %2032 = vmatprep.mubr.f32.mxu0 %v735_v40 }
 0x277   :  { %v1680_v44 = vpop.f32.mrb[49].mxu1 }
 0x278   :  { %v1681_v45 = vadd.f32 %v1680_v44, %v1679_v43  ;;  %v1682_v46 = vpop.f32.mrb[50].mxu1  ;;  %2033 = vmatmul.mubr.f32.gmra.mrb[6].mxu0 %v736_v42 }
 0x279   :  { %v1683_v47 = vpop.f32.mrb[51].mxu1 }
 0x27a   :  { %v635_v48 = vadd.f32 %v1681_v45, %v2651_v35  ;;  %v1684_v51 = vadd.f32 %v1683_v47, %v1682_v46 }
 0x27c   :  { %v737_v52 = vmax.f32 %v635_v48, 0.0  ;;  %v638_v53 = vadd.f32 %v1684_v51, %v2651_v35 }
 0x27e   :  { %v738_v54 = vmax.f32 %v638_v53, 0.0  ;;  %v1685_v55 = vpop.f32.mrb[52].mxu1  ;;  %2035 = vmatprep.mubr.f32.mxu0 %v737_v52 }
 0x27f   :  { %v1686_v57 = vpop.f32.mrb[53].mxu1 }
 0x280   :  { %v1687_v60 = vadd.f32 %v1686_v57, %v1685_v55  ;;  %v1688_v61 = vpop.f32.mrb[54].mxu1  ;;  %2036 = vmatmul.mubr.f32.gmra.mrb[8].mxu0 %v738_v54 }
 0x281   :  { %v1689_v62 = vpop.f32.mrb[55].mxu1 }
 0x282   :  { %v643_v63 = vadd.f32 %v1687_v60, %v2651_v35  ;;  %v1690_v18 = vadd.f32 %v1689_v62, %v1688_v61 }
 0x284   :  { %v739_v19 = vmax.f32 %v643_v63, 0.0  ;;  %v646_v20 = vadd.f32 %v1690_v18, %v2651_v35 }
 0x286   :  { %v740_v23 = vmax.f32 %v646_v20, 0.0  ;;  %v1691_v24 = vpop.f32.mrb[56].mxu1  ;;  %2038 = vmatprep.mubr.f32.mxu0 %v739_v19 }
 0x287   :  { %v1692_v25 = vpop.f32.mrb[57].mxu1 }
 0x288   :  { %v1693_v33 = vadd.f32 %v1692_v25, %v1691_v24  ;;  %v1694_v34 = vpop.f32.mrb[58].mxu1  ;;  %2039 = vmatmul.mubr.f32.gmra.mrb[10].mxu0 %v740_v23 }
 0x289   :  { %v1695_v36 = vpop.f32.mrb[59].mxu1 }
 0x28a   :  { %v651_v37 = vadd.f32 %v1693_v33, %v2651_v35  ;;  %v1696_v38 = vadd.f32 %v1695_v36, %v1694_v34 }
 0x28c   :  { %v741_v39 = vmax.f32 %v651_v37, 0.0  ;;  %v654_v40 = vadd.f32 %v1696_v38, %v2651_v35 }
 0x28e   :  { %v742_v41 = vmax.f32 %v654_v40, 0.0  ;;  %v1697_v42 = vpop.f32.mrb[60].mxu1  ;;  %2041 = vmatprep.mubr.f32.mxu0 %v741_v39 }
 0x28f   :  { %v1698_v43 = vpop.f32.mrb[61].mxu1 }
 0x290   :  { %v1699_v44 = vadd.f32 %v1698_v43, %v1697_v42  ;;  %v1700_v45 = vpop.f32.mrb[62].mxu1  ;;  %2042 = vmatmul.mubr.f32.gmra.mrb[12].mxu0 %v742_v41 }
 0x291   :  { %v1701_v46 = vpop.f32.mrb[63].mxu1 }
 0x292   :  { %v659_v47 = vadd.f32 %v1699_v44, %v2651_v35  ;;  %v1702_v48 = vadd.f32 %v1701_v46, %v1700_v45 }
 0x294   :  { %v743_v51 = vmax.f32 %v659_v47, 0.0  ;;  %v662_v52 = vadd.f32 %v1702_v48, %v2651_v35 }
 0x296   :  { %v744_v53 = vmax.f32 %v662_v52, 0.0  ;;  %v1703_v54 = vpop.f32.mrb[64].mxu1  ;;  %2044 = vmatprep.mubr.f32.mxu0 %v743_v51 }
 0x297   :  { %v1704_v55 = vpop.f32.mrb[65].mxu1 }
 0x298   :  { %v1705_v57 = vadd.f32 %v1704_v55, %v1703_v54  ;;  %v1706_v60 = vpop.f32.mrb[66].mxu1  ;;  %2045 = vmatmul.mubr.f32.gmra.mrb[14].mxu0 %v744_v53 }
 0x299   :  { %v1707_v61 = vpop.f32.mrb[67].mxu1 }
 0x29a   :  { %v667_v62 = vadd.f32 %v1705_v57, %v2651_v35  ;;  %v1708_v63 = vadd.f32 %v1707_v61, %v1706_v60 }
 0x29c   :  { %v745_v18 = vmax.f32 %v667_v62, 0.0  ;;  %v670_v19 = vadd.f32 %v1708_v63, %v2651_v35 }
 0x29e   :  { %v746_v20 = vmax.f32 %v670_v19, 0.0  ;;  %v1709_v23 = vpop.f32.mrb[68].mxu1  ;;  %2047 = vmatprep.mubr.f32.mxu0 %v745_v18 }
 0x29f   :  { %v1710_v24 = vpop.f32.mrb[69].mxu1 }
 0x2a0   :  { %v1711_v25 = vadd.f32 %v1710_v24, %v1709_v23  ;;  %v1712_v33 = vpop.f32.mrb[70].mxu1  ;;  %2048 = vmatmul.mubr.f32.gmra.mrb[16].mxu0 %v746_v20 }
 0x2a1   :  { %v1713_v34 = vpop.f32.mrb[71].mxu1 }
 0x2a2   :  { %v675_v36 = vadd.f32 %v1711_v25, %v2651_v35  ;;  %v1714_v37 = vadd.f32 %v1713_v34, %v1712_v33 }
 0x2a4   :  { %v747_v38 = vmax.f32 %v675_v36, 0.0  ;;  %v678_v39 = vadd.f32 %v1714_v37, %v2651_v35 }
 0x2a6   :  { %v748_v40 = vmax.f32 %v678_v39, 0.0  ;;  %v1715_v41 = vpop.f32.mrb[72].mxu1  ;;  %2050 = vmatprep.mubr.f32.mxu0 %v747_v38 }
 0x2a7   :  { %v1716_v42 = vpop.f32.mrb[73].mxu1 }
 0x2a8   :  { %v1717_v43 = vadd.f32 %v1716_v42, %v1715_v41  ;;  %v1718_v44 = vpop.f32.mrb[74].mxu1  ;;  %2051 = vmatmul.mubr.f32.gmra.mrb[18].mxu0 %v748_v40 }
 0x2a9   :  { %v1719_v45 = vpop.f32.mrb[75].mxu1 }
 0x2aa   :  { %v683_v46 = vadd.f32 %v1717_v43, %v2651_v35  ;;  %v1720_v47 = vadd.f32 %v1719_v45, %v1718_v44 }
 0x2ac   :  { %v749_v48 = vmax.f32 %v683_v46, 0.0  ;;  %v686_v51 = vadd.f32 %v1720_v47, %v2651_v35 }
 0x2ae   :  { %v750_v52 = vmax.f32 %v686_v51, 0.0  ;;  %v1721_v53 = vpop.f32.mrb[76].mxu1  ;;  %2053 = vmatprep.mubr.f32.mxu0 %v749_v48 }
 0x2af   :  { %v1722_v54 = vpop.f32.mrb[77].mxu1 }
 0x2b0   :  { %v1723_v55 = vadd.f32 %v1722_v54, %v1721_v53  ;;  %v1724_v57 = vpop.f32.mrb[78].mxu1  ;;  %2054 = vmatmul.mubr.f32.gmra.mrb[20].mxu0 %v750_v52 }
 0x2b1   :  { %v1725_v60 = vpop.f32.mrb[79].mxu1 }
 0x2b2   :  { %v691_v61 = vadd.f32 %v1723_v55, %v2651_v35  ;;  %v1726_v62 = vadd.f32 %v1725_v60, %v1724_v57 }
 0x2b4   :  { %v751_v63 = vmax.f32 %v691_v61, 0.0  ;;  %v694_v18 = vadd.f32 %v1726_v62, %v2651_v35 }
 0x2b6   :  { %v752_v19 = vmax.f32 %v694_v18, 0.0  ;;  %v1727_v20 = vpop.f32.mrb[80].mxu1  ;;  %2056 = vmatprep.mubr.f32.mxu0 %v751_v63 }
 0x2b7   :  { %v1728_v23 = vpop.f32.mrb[81].mxu1 }
 0x2b8   :  { %v1729_v24 = vadd.f32 %v1728_v23, %v1727_v20  ;;  %v1730_v25 = vpop.f32.mrb[82].mxu1  ;;  %2057 = vmatmul.mubr.f32.gmra.mrb[22].mxu0 %v752_v19 }
 0x2b9   :  { %v1731_v33 = vpop.f32.mrb[83].mxu1 }
 0x2ba   :  { %v699_v34 = vadd.f32 %v1729_v24, %v2651_v35  ;;  %v1732_v36 = vadd.f32 %v1731_v33, %v1730_v25 }
 0x2bc   :  { %v753_v37 = vmax.f32 %v699_v34, 0.0  ;;  %v702_v38 = vadd.f32 %v1732_v36, %v2651_v35 }
 0x2be   :  { %v754_v39 = vmax.f32 %v702_v38, 0.0  ;;  %v1733_v40 = vpop.f32.mrb[84].mxu1  ;;  %2059 = vmatprep.mubr.f32.mxu0 %v753_v37 }
 0x2bf   :  { %v1734_v41 = vpop.f32.mrb[85].mxu1 }
 0x2c0   :  { %v1735_v42 = vadd.f32 %v1734_v41, %v1733_v40  ;;  %v1736_v43 = vpop.f32.mrb[86].mxu1  ;;  %2060 = vmatmul.mubr.f32.gmra.mrb[24].mxu0 %v754_v39 }
 0x2c1   :  { %v1737_v44 = vpop.f32.mrb[87].mxu1 }
 0x2c2   :  { %v707_v45 = vadd.f32 %v1735_v42, %v2651_v35  ;;  %v1738_v46 = vadd.f32 %v1737_v44, %v1736_v43 }
 0x2c4   :  { %v755_v47 = vmax.f32 %v707_v45, 0.0  ;;  %v710_v48 = vadd.f32 %v1738_v46, %v2651_v35 }
 0x2c6   :  { %v756_v51 = vmax.f32 %v710_v48, 0.0  ;;  %v1739_v52 = vpop.f32.mrb[88].mxu1  ;;  %2062 = vmatprep.mubr.f32.mxu0 %v755_v47 }
 0x2c7   :  { %v1740_v53 = vpop.f32.mrb[89].mxu1 }
 0x2c8   :  { %v1741_v54 = vadd.f32 %v1740_v53, %v1739_v52  ;;  %v1742_v55 = vpop.f32.mrb[90].mxu1  ;;  %2063 = vmatmul.mubr.f32.gmra.mrb[26].mxu0 %v756_v51 }
 0x2c9   :  { %v1743_v57 = vpop.f32.mrb[91].mxu1 }
 0x2ca   :  { %v715_v60 = vadd.f32 %v1741_v54, %v2651_v35  ;;  %v1744_v61 = vadd.f32 %v1743_v57, %v1742_v55 }
 0x2cc   :  { %v757_v62 = vmax.f32 %v715_v60, 0.0  ;;  %v718_v63 = vadd.f32 %v1744_v61, %v2651_v35 }
 0x2ce   :  { %v758_v18 = vmax.f32 %v718_v63, 0.0  ;;  %v1745_v19 = vpop.f32.mrb[92].mxu1  ;;  %2065 = vmatprep.mubr.f32.mxu0 %v757_v62 }
 0x2cf   :  { %v1746_v20 = vpop.f32.mrb[93].mxu1 }
 0x2d0   :  { %v1747_v23 = vadd.f32 %v1746_v20, %v1745_v19  ;;  %v1748_v24 = vpop.f32.mrb[94].mxu1  ;;  %2066 = vmatmul.mubr.f32.gmra.mrb[28].mxu0 %v758_v18 }
 0x2d1   :  { %v1749_v25 = vpop.f32.mrb[95].mxu1 }
 0x2d2   :  { %v723_v33 = vadd.f32 %v1747_v23, %v2651_v35  ;;  %v1750_v34 = vadd.f32 %v1749_v25, %v1748_v24 }
 0x2d4   :  { %v759_v36 = vmax.f32 %v723_v33, 0.0  ;;  %v726_v37 = vadd.f32 %v1750_v34, %v2651_v35 }
 0x2d6   :  { %v760_v38 = vmax.f32 %v726_v37, 0.0  ;;  %2068 = vmatprep.mubr.f32.mxu0 %v759_v36 }
 0x2d8   :  { %2069 = vmatmul.mubr.f32.gmra.mrb[30].mxu0 %v760_v38 }
 0x2d9   :  { %1057 = vmatprep.mubr.bf16.mxu0 %v2552_v56 }
 0x333   :  { %v2025_v39 = vpop.f32.mrb[0].mxu0 }
 0x334   :  { %v843_v40 = vpop.f32.mrb[1].mxu0 }
 0x335   :  { %v1002_v41 = vpack.c.bf16 %v2025_v39, %v843_v40 }
 0x33b   :  { %v2028_v42 = vpop.f32.mrb[2].mxu0 }
 0x33c   :  { %v853_v43 = vpop.f32.mrb[3].mxu0 }
 0x33d   :  { %v1003_v44 = vpack.c.bf16 %v2028_v42, %v853_v43 }
 0x343   :  { %v2031_v45 = vpop.f32.mrb[4].mxu0 }
 0x344   :  { %v863_v46 = vpop.f32.mrb[5].mxu0 }
 0x345   :  { %v1004_v47 = vpack.c.bf16 %v2031_v45, %v863_v46 }
 0x34b   :  { %v2034_v48 = vpop.f32.mrb[6].mxu0 }
 0x34c   :  { %v873_v51 = vpop.f32.mrb[7].mxu0 }
 0x34d   :  { %v1005_v52 = vpack.c.bf16 %v2034_v48, %v873_v51 }
 0x353   :  { %v2037_v53 = vpop.f32.mrb[8].mxu0 }
 0x354   :  { %v883_v54 = vpop.f32.mrb[9].mxu0 }
 0x355   :  { %v1006_v35 = vpack.c.bf16 %v2037_v53, %v883_v54 }
 0x35b   :  { %v2040_v55 = vpop.f32.mrb[10].mxu0 }
 0x35c   :  { %v893_v57 = vpop.f32.mrb[11].mxu0 }
 0x35d   :  { %v1007_v60 = vpack.c.bf16 %v2040_v55, %v893_v57 }
 0x363   :  { %v2043_v61 = vpop.f32.mrb[12].mxu0 }
 0x364   :  { %v903_v56 = vpop.f32.mrb[13].mxu0 }
 0x365   :  { %v1008_v62 = vpack.c.bf16 %v2043_v61, %v903_v56 }
 0x36b   :  { %v2046_v63 = vpop.f32.mrb[14].mxu0 }
 0x36c   :  { %v913_v18 = vpop.f32.mrb[15].mxu0 }
 0x36d   :  { %v1009_v19 = vpack.c.bf16 %v2046_v63, %v913_v18 }
 0x373   :  { %v2049_v20 = vpop.f32.mrb[16].mxu0 }
 0x374   :  { %v923_v23 = vpop.f32.mrb[17].mxu0 }
 0x375   :  { %v1010_v24 = vpack.c.bf16 %v2049_v20, %v923_v23 }
 0x377   :  { %1799 = vmatprep.subr.bf16.mxu0 %v1010_v24 }
 0x378   :  { %1800 = vmatpush3.bf16.msra.mxu0 %v1002_v41 }
 0x37b   :  { %v2052_v25 = vpop.f32.mrb[18].mxu0 }
 0x37c   :  { %v933_v33 = vpop.f32.mrb[19].mxu0 }
 0x37d   :  { %v1011_v34 = vpack.c.bf16 %v2052_v25, %v933_v33 }
 0x37f   :  { %1801 = vmatprep.subr.bf16.mxu0 %v1011_v34 }
 0x380   :  { %1802 = vmatpush3.bf16.msra.mxu0 %v1003_v44 }
 0x383   :  { %v2055_v36 = vpop.f32.mrb[20].mxu0 }
 0x384   :  { %v943_v37 = vpop.f32.mrb[21].mxu0 }
 0x385   :  { %v1012_v38 = vpack.c.bf16 %v2055_v36, %v943_v37 }
 0x387   :  { %1803 = vmatprep.subr.bf16.mxu0 %v1012_v38 }
 0x388   :  { %1804 = vmatpush3.bf16.msra.mxu0 %v1004_v47 }
 0x38b   :  { %v2058_v39 = vpop.f32.mrb[22].mxu0 }
 0x38c   :  { %v953_v40 = vpop.f32.mrb[23].mxu0 }
 0x38d   :  { %v1013_v42 = vpack.c.bf16 %v2058_v39, %v953_v40 }
 0x38f   :  { %1805 = vmatprep.subr.bf16.mxu0 %v1013_v42 }
 0x390   :  { %1806 = vmatpush3.bf16.msra.mxu0 %v1005_v52 }
 0x393   :  { %v2061_v43 = vpop.f32.mrb[24].mxu0 }
 0x394   :  { %v963_v45 = vpop.f32.mrb[25].mxu0 }
 0x395   :  { %v1014_v46 = vpack.c.bf16 %v2061_v43, %v963_v45 }
 0x397   :  { %1807 = vmatprep.subr.bf16.mxu0 %v1014_v46 }
 0x398   :  { %1808 = vmatpush3.bf16.msra.mxu0 %v1006_v35 }
 0x39b   :  { %v2064_v41 = vpop.f32.mrb[26].mxu0 }
 0x39c   :  { %v973_v48 = vpop.f32.mrb[27].mxu0 }
 0x39d   :  { %v1015_v51 = vpack.c.bf16 %v2064_v41, %v973_v48 }
 0x39f   :  { %1809 = vmatprep.subr.bf16.mxu0 %v1015_v51 }
 0x3a0   :  { %1810 = vmatpush3.bf16.msra.mxu0 %v1007_v60 }
 0x3a3   :  { %v2067_v44 = vpop.f32.mrb[28].mxu0 }
 0x3a4   :  { %v983_v53 = vpop.f32.mrb[29].mxu0 }
 0x3a5   :  { %v1016_v54 = vpack.c.bf16 %v2067_v44, %v983_v53 }
 0x3a7   :  { %1811 = vmatprep.subr.bf16.mxu0 %v1016_v54 }
 0x3a8   :  { %1812 = vmatpush3.bf16.msra.mxu0 %v1008_v62 }
 0x3ab   :  { %v2070_v47 = vpop.f32.mrb[30].mxu0 }
 0x3ac   :  { %v993_v55 = vpop.f32.mrb[31].mxu0 }
 0x3ad   :  { %v1017_v57 = vpack.c.bf16 %v2070_v47, %v993_v55 }
 0x3af   :  { %1813 = vmatprep.subr.bf16.mxu0 %v1017_v57 }
 0x3b0   :  { %1814 = vmatpush3.bf16.msra.mxu0 %v1009_v19 }
 0x3b3   :  { %1058 = vmatmul.mubr.bf16.vlgmr.msra.gmra.mrb[32].mxu0 %v2555_v49 }
 0x3b4   :  { %1065 = vmatprep.mubr.bf16.mxu0 %v2557_v50 }
 0x3bb   :  { %1066 = vmatmul.mubr.bf16.gmra.mrb[36].mxu0 %v2561_v58  ;;  %v2720_v58 = vld [vmem:[%s3030_s5] ss:$0 sm:$0xff]  ;;  %s2442_s5 = smov [#allocation10]  }
 0x3bc   :  { %1073 = vmatprep.mubr.bf16.mxu0 %v2563_v59  ;;  %s1543_s23 = sshll.u32 %s2442_s5, 4  ;;  %s1544_s23 = int_to_ptr.vmem [resolvable:$true] %s1543_s23 }
 0x3bd   :  { %s2406_s25 = scalar_lea.vmem %s1544_s23, 4096  ;;  %p2411_p5 = scmp.lt.s32.totalorder %s1544_s23, %s1544_s23 }
 0x3be   :  { %p2407_p4 = scmp.ne.s32.totalorder %s1544_s23, %s2406_s25  ;;  %p2412_p6 = scmp.lt.s32.totalorder %s2406_s25, %s2406_s25 }
 0x3c0   :  { %p2413_p7 = por %p2412_p6, %p2411_p5 }
 0x3c2   :  { %p2414_p8 = pnand %p2413_p7, %p2407_p4 }
 0x3c3   :  { %1074 = vmatmul.mubr.bf16.gmra.mrb[40].mxu0 %v2567_v0 }
 0x3c4   :  { %1081 = vmatprep.mubr.bf16.mxu0 %v2569_v1 }
 0x3cb   :  { %1082 = vmatmul.mubr.bf16.gmra.mrb[44].mxu0 %v2573_v2 }
 0x3cc   :  { %1089 = vmatprep.mubr.bf16.mxu0 %v2575_v3 }
 0x3d3   :  { %1090 = vmatmul.mubr.bf16.gmra.mrb[48].mxu0 %v2579_v4 }
 0x3d4   :  { %1097 = vmatprep.mubr.bf16.mxu0 %v2581_v5 }
 0x3db   :  { %1098 = vmatmul.mubr.bf16.gmra.mrb[52].mxu0 %v2585_v6 }
 0x3dc   :  { %1105 = vmatprep.mubr.bf16.mxu0 %v2587_v7 }
 0x3e3   :  { %1106 = vmatmul.mubr.bf16.gmra.mrb[56].mxu0 %v2591_v8 }
 0x3e4   :  { %1113 = vmatprep.mubr.bf16.mxu0 %v2593_v9 }
 0x3eb   :  { %1114 = vmatmul.mubr.bf16.gmra.mrb[60].mxu0 %v2597_v10 }
 0x3ec   :  { %1121 = vmatprep.mubr.bf16.mxu0 %v2599_v11 }
 0x3f3   :  { %1122 = vmatmul.mubr.bf16.gmra.mrb[64].mxu0 %v2603_v12 }
 0x3f4   :  { %1129 = vmatprep.mubr.bf16.mxu0 %v2605_v13 }
 0x3fb   :  { %1130 = vmatmul.mubr.bf16.gmra.mrb[68].mxu0 %v2609_v14 }
 0x3fc   :  { %1137 = vmatprep.mubr.bf16.mxu0 %v2611_v15 }
 0x403   :  { %1138 = vmatmul.mubr.bf16.gmra.mrb[72].mxu0 %v2615_v16 }
 0x404   :  { %1145 = vmatprep.mubr.bf16.mxu0 %v2617_v17 }
 0x40b   :  { %1146 = vmatmul.mubr.bf16.gmra.mrb[76].mxu0 %v2621_v21 }
 0x40c   :  { %1153 = vmatprep.mubr.bf16.mxu0 %v2623_v22 }
 0x413   :  { %1154 = vmatmul.mubr.bf16.gmra.mrb[80].mxu0 %v2627_v26 }
 0x414   :  { %1161 = vmatprep.mubr.bf16.mxu0 %v2629_v27 }
 0x41b   :  { %1162 = vmatmul.mubr.bf16.gmra.mrb[84].mxu0 %v2633_v28 }
 0x41c   :  { %1169 = vmatprep.mubr.bf16.mxu0 %v2635_v29 }
 0x423   :  { %1170 = vmatmul.mubr.bf16.gmra.mrb[88].mxu0 %v2639_v30 }
 0x424   :  { %1177 = vmatprep.mubr.bf16.mxu0 %v2641_v31 }
 0x42b   :  { %1178 = vmatmul.mubr.bf16.gmra.mrb[92].mxu0 %v2645_v32 }
 0x486   :  { %v1815_v49 = vpop.f32.mrb[32].mxu0 }
 0x487   :  { %v1816_v50 = vpop.f32.mrb[33].mxu0 }
 0x488   :  { %v1817_v59 = vadd.f32 %v1816_v50, %v1815_v49  ;;  %v1818_v0 = vpop.f32.mrb[34].mxu0 }
 0x489   :  { %v1819_v1 = vpop.f32.mrb[35].mxu0 }
 0x48a   :  { %v1820_v2 = vadd.f32 %v1819_v1, %v1818_v0  ;;  %v2723_v3 = vadd.f32 %v1817_v59, %v2720_v58 }
 0x48c   :  { %1186 = vmax.xlane.f32.xlu0 %v2723_v3  ;;  %v2727_v5 = vadd.f32 %v1820_v2, %v2720_v58 }
 0x48e   :  { %v1821_v4 = vpop.f32.mrb[36].mxu0 }
 0x48f   :  { %v1822_v6 = vpop.f32.mrb[37].mxu0 }
 0x490   :  { %v1823_v7 = vadd.f32 %v1822_v6, %v1821_v4  ;;  %1188 = vmax.xlane.f32.xlu0 %v2727_v5  ;;  %v1824_v8 = vpop.f32.mrb[38].mxu0 }
 0x491   :  { %v1825_v9 = vpop.f32.mrb[39].mxu0 }
 0x492   :  { %v1826_v10 = vadd.f32 %v1825_v9, %v1824_v8  ;;  %v2731_v11 = vadd.f32 %v1823_v7, %v2720_v58 }
 0x494   :  { %1190 = vmax.xlane.f32.xlu1 %v2731_v11  ;;  %v2735_v13 = vadd.f32 %v1826_v10, %v2720_v58 }
 0x496   :  { %v1827_v12 = vpop.f32.mrb[40].mxu0 }
 0x497   :  { %v1828_v14 = vpop.f32.mrb[41].mxu0 }
 0x498   :  { %v1829_v15 = vadd.f32 %v1828_v14, %v1827_v12  ;;  %v1830_v16 = vpop.f32.mrb[42].mxu0  ;;  %1192 = vmax.xlane.f32.xlu1 %v2735_v13 }
 0x499   :  { %v1831_v17 = vpop.f32.mrb[43].mxu0 }
 0x49a   :  { %v1832_v21 = vadd.f32 %v1831_v17, %v1830_v16  ;;  %v2739_v22 = vadd.f32 %v1829_v15, %v2720_v58 }
 0x49c   :  { %1194 = vmax.xlane.f32.xlu0 %v2739_v22  ;;  %v2743_v26 = vadd.f32 %v1832_v21, %v2720_v58 }
 0x49e   :  { %v1833_v27 = vpop.f32.mrb[44].mxu0  ;;  %1196 = vmax.xlane.f32.xlu1 %v2743_v26 }
 0x49f   :  { %v1834_v28 = vpop.f32.mrb[45].mxu0 }
 0x4a0   :  { %v1835_v29 = vadd.f32 %v1834_v28, %v1833_v27  ;;  %v1836_v30 = vpop.f32.mrb[46].mxu0 }
 0x4a1   :  { %v1837_v31 = vpop.f32.mrb[47].mxu0 }
 0x4a2   :  { %v1838_v32 = vadd.f32 %v1837_v31, %v1836_v30  ;;  %v2747_v52 = vadd.f32 %v1835_v29, %v2720_v58 }
 0x4a4   :  { %1198 = vmax.xlane.f32.xlu0 %v2747_v52  ;;  %v2751_v35 = vadd.f32 %v1838_v32, %v2720_v58 }
 0x4a6   :  { %v1839_v60 = vpop.f32.mrb[48].mxu0  ;;  %1200 = vmax.xlane.f32.xlu1 %v2751_v35 }
 0x4a7   :  { %v1840_v61 = vpop.f32.mrb[49].mxu0 }
 0x4a8   :  { %v1841_v56 = vadd.f32 %v1840_v61, %v1839_v60  ;;  %v1842_v62 = vpop.f32.mrb[50].mxu0 }
 0x4a9   :  { %v1843_v63 = vpop.f32.mrb[51].mxu0 }
 0x4aa   :  { %v1844_v18 = vadd.f32 %v1843_v63, %v1842_v62  ;;  %v2755_v19 = vadd.f32 %v1841_v56, %v2720_v58 }
 0x4ac   :  { %1202 = vmax.xlane.f32.xlu0 %v2755_v19  ;;  %v2759_v20 = vadd.f32 %v1844_v18, %v2720_v58 }
 0x4ae   :  { %v1845_v23 = vpop.f32.mrb[52].mxu0  ;;  %1204 = vmax.xlane.f32.xlu1 %v2759_v20 }
 0x4af   :  { %v1846_v24 = vpop.f32.mrb[53].mxu0 }
 0x4b0   :  { %v1847_v25 = vadd.f32 %v1846_v24, %v1845_v23  ;;  %v1848_v33 = vpop.f32.mrb[54].mxu0 }
 0x4b1   :  { %v1849_v34 = vpop.f32.mrb[55].mxu0 }
 0x4b2   :  { %v1850_v36 = vadd.f32 %v1849_v34, %v1848_v33  ;;  %v2763_v37 = vadd.f32 %v1847_v25, %v2720_v58 }
 0x4b4   :  { %1206 = vmax.xlane.f32.xlu0 %v2763_v37  ;;  %v2767_v38 = vadd.f32 %v1850_v36, %v2720_v58 }
 0x4b6   :  { %v1851_v39 = vpop.f32.mrb[56].mxu0  ;;  %1208 = vmax.xlane.f32.xlu1 %v2767_v38 }
 0x4b7   :  { %v1852_v40 = vpop.f32.mrb[57].mxu0 }
 0x4b8   :  { %v1853_v42 = vadd.f32 %v1852_v40, %v1851_v39  ;;  %v1854_v43 = vpop.f32.mrb[58].mxu0 }
 0x4b9   :  { %v1855_v45 = vpop.f32.mrb[59].mxu0 }
 0x4ba   :  { %v1856_v46 = vadd.f32 %v1855_v45, %v1854_v43  ;;  %v2771_v41 = vadd.f32 %v1853_v42, %v2720_v58 }
 0x4bc   :  { %1210 = vmax.xlane.f32.xlu0 %v2771_v41  ;;  %v2775_v48 = vadd.f32 %v1856_v46, %v2720_v58 }
 0x4be   :  { %v1857_v51 = vpop.f32.mrb[60].mxu0  ;;  %1212 = vmax.xlane.f32.xlu1 %v2775_v48 }
 0x4bf   :  { %v1858_v44 = vpop.f32.mrb[61].mxu0 }
 0x4c0   :  { %v1859_v53 = vadd.f32 %v1858_v44, %v1857_v51  ;;  %v1860_v54 = vpop.f32.mrb[62].mxu0 }
 0x4c1   :  { %v1861_v47 = vpop.f32.mrb[63].mxu0 }
 0x4c2   :  { %v1862_v55 = vadd.f32 %v1861_v47, %v1860_v54  ;;  %v2779_v57 = vadd.f32 %v1859_v53, %v2720_v58 }
 0x4c4   :  { %1214 = vmax.xlane.f32.xlu0 %v2779_v57  ;;  %v2783_v49 = vadd.f32 %v1862_v55, %v2720_v58 }
 0x4c6   :  { %v1863_v50 = vpop.f32.mrb[64].mxu0  ;;  %1216 = vmax.xlane.f32.xlu1 %v2783_v49 }
 0x4c7   :  { %v1864_v59 = vpop.f32.mrb[65].mxu0 }
 0x4c8   :  { %v1865_v0 = vadd.f32 %v1864_v59, %v1863_v50  ;;  %v1866_v1 = vpop.f32.mrb[66].mxu0 }
 0x4c9   :  { %v1867_v2 = vpop.f32.mrb[67].mxu0 }
 0x4ca   :  { %v1868_v4 = vadd.f32 %v1867_v2, %v1866_v1  ;;  %v2787_v6 = vadd.f32 %v1865_v0, %v2720_v58 }
 0x4cc   :  { %1218 = vmax.xlane.f32.xlu0 %v2787_v6  ;;  %v2791_v7 = vadd.f32 %v1868_v4, %v2720_v58 }
 0x4ce   :  { %v1869_v8 = vpop.f32.mrb[68].mxu0  ;;  %1220 = vmax.xlane.f32.xlu1 %v2791_v7 }
 0x4cf   :  { %v1870_v9 = vpop.f32.mrb[69].mxu0 }
 0x4d0   :  { %v1871_v10 = vadd.f32 %v1870_v9, %v1869_v8  ;;  %v1872_v12 = vpop.f32.mrb[70].mxu0 }
 0x4d1   :  { %v1873_v14 = vpop.f32.mrb[71].mxu0 }
 0x4d2   :  { %v1874_v15 = vadd.f32 %v1873_v14, %v1872_v12  ;;  %v2795_v16 = vadd.f32 %v1871_v10, %v2720_v58 }
 0x4d4   :  { %1222 = vmax.xlane.f32.xlu0 %v2795_v16  ;;  %v2799_v17 = vadd.f32 %v1874_v15, %v2720_v58 }
 0x4d6   :  { %v1875_v21 = vpop.f32.mrb[72].mxu0  ;;  %1224 = vmax.xlane.f32.xlu1 %v2799_v17 }
 0x4d7   :  { %v1876_v27 = vpop.f32.mrb[73].mxu0 }
 0x4d8   :  { %v1877_v28 = vadd.f32 %v1876_v27, %v1875_v21  ;;  %v1878_v29 = vpop.f32.mrb[74].mxu0 }
 0x4d9   :  { %v1879_v30 = vpop.f32.mrb[75].mxu0 }
 0x4da   :  { %v1880_v31 = vadd.f32 %v1879_v30, %v1878_v29  ;;  %v2803_v32 = vadd.f32 %v1877_v28, %v2720_v58 }
 0x4dc   :  { %1226 = vmax.xlane.f32.xlu0 %v2803_v32  ;;  %v2807_v60 = vadd.f32 %v1880_v31, %v2720_v58 }
 0x4de   :  { %v1881_v61 = vpop.f32.mrb[76].mxu0  ;;  %1228 = vmax.xlane.f32.xlu1 %v2807_v60 }
 0x4df   :  { %v1882_v56 = vpop.f32.mrb[77].mxu0 }
 0x4e0   :  { %v1883_v62 = vadd.f32 %v1882_v56, %v1881_v61  ;;  %v1884_v63 = vpop.f32.mrb[78].mxu0 }
 0x4e1   :  { %v1885_v18 = vpop.f32.mrb[79].mxu0 }
 0x4e2   :  { %v1886_v23 = vadd.f32 %v1885_v18, %v1884_v63  ;;  %v2811_v24 = vadd.f32 %v1883_v62, %v2720_v58 }
 0x4e4   :  { %1230 = vmax.xlane.f32.xlu0 %v2811_v24  ;;  %v2815_v25 = vadd.f32 %v1886_v23, %v2720_v58 }
 0x4e6   :  { %v1887_v33 = vpop.f32.mrb[80].mxu0  ;;  %1232 = vmax.xlane.f32.xlu1 %v2815_v25 }
 0x4e7   :  { %v1888_v34 = vpop.f32.mrb[81].mxu0 }
 0x4e8   :  { %v1889_v36 = vadd.f32 %v1888_v34, %v1887_v33  ;;  %v1890_v39 = vpop.f32.mrb[82].mxu0 }
 0x4e9   :  { %v1891_v40 = vpop.f32.mrb[83].mxu0 }
 0x4ea   :  { %v1892_v42 = vadd.f32 %v1891_v40, %v1890_v39  ;;  %v2819_v43 = vadd.f32 %v1889_v36, %v2720_v58 }
 0x4ec   :  { %1234 = vmax.xlane.f32.xlu0 %v2819_v43  ;;  %v2823_v45 = vadd.f32 %v1892_v42, %v2720_v58 }
 0x4ee   :  { %v1893_v46 = vpop.f32.mrb[84].mxu0  ;;  %1236 = vmax.xlane.f32.xlu1 %v2823_v45 }
 0x4ef   :  { %v1894_v51 = vpop.f32.mrb[85].mxu0 }
 0x4f0   :  { %v1895_v44 = vadd.f32 %v1894_v51, %v1893_v46  ;;  %v1896_v53 = vpop.f32.mrb[86].mxu0 }
 0x4f1   :  { %v1897_v54 = vpop.f32.mrb[87].mxu0 }
 0x4f2   :  { %v1898_v47 = vadd.f32 %v1897_v54, %v1896_v53  ;;  %v2827_v55 = vadd.f32 %v1895_v44, %v2720_v58 }
 0x4f4   :  { %1238 = vmax.xlane.f32.xlu0 %v2827_v55  ;;  %v2831_v50 = vadd.f32 %v1898_v47, %v2720_v58 }
 0x4f6   :  { %v1899_v59 = vpop.f32.mrb[88].mxu0  ;;  %1240 = vmax.xlane.f32.xlu1 %v2831_v50 }
 0x4f7   :  { %v1900_v0 = vpop.f32.mrb[89].mxu0 }
 0x4f8   :  { %v1901_v1 = vadd.f32 %v1900_v0, %v1899_v59  ;;  %v1902_v2 = vpop.f32.mrb[90].mxu0 }
 0x4f9   :  { %v1903_v4 = vpop.f32.mrb[91].mxu0 }
 0x4fa   :  { %v1904_v8 = vadd.f32 %v1903_v4, %v1902_v2  ;;  %v2835_v9 = vadd.f32 %v1901_v1, %v2720_v58 }
 0x4fc   :  { %1242 = vmax.xlane.f32.xlu0 %v2835_v9  ;;  %v2839_v10 = vadd.f32 %v1904_v8, %v2720_v58 }
 0x4fe   :  { %v1905_v12 = vpop.f32.mrb[92].mxu0  ;;  %1244 = vmax.xlane.f32.xlu1 %v2839_v10 }
 0x4ff   :  { %v1906_v14 = vpop.f32.mrb[93].mxu0 }
 0x500   :  { %v1907_v15 = vadd.f32 %v1906_v14, %v1905_v12  ;;  %v1908_v21 = vpop.f32.mrb[94].mxu0 }
 0x501   :  { %v1909_v27 = vpop.f32.mrb[95].mxu0 }
 0x502   :  { %v1910_v28 = vadd.f32 %v1909_v27, %v1908_v21  ;;  %v2843_v29 = vadd.f32 %v1907_v15, %v2720_v58 }
 0x504   :  { %1246 = vmax.xlane.f32.xlu0 %v2843_v29  ;;  %v2847_v30 = vadd.f32 %v1910_v28, %v2720_v58 }
 0x506   :  { %1248 = vmax.xlane.f32.xlu1 %v2847_v30 }
 0x519   :  { %v1187_v31 = vpop.xlane.xlu0 %1186 }
 0x51a   :  { %v2851_v61 = vsub.f32 %v2723_v3, %v1187_v31 }
 0x51c   :  { %v1282_v56 = vmul.f32 1.442695, %v2851_v61 }
 0x51d   :  { %v1189_v62 = vpop.xlane.xlu0 %1188 }
 0x51e   :  { %2190 = vpow2.f32 %v1282_v56  ;;  %v2855_v63 = vsub.f32 %v2727_v5, %v1189_v62 }
 0x520   :  { %v1284_v18 = vmul.f32 1.442695, %v2855_v63 }
 0x521   :  { %v1191_v23 = vpop.xlane.xlu1 %1190 }
 0x522   :  { %2192 = vpow2.f32 %v1284_v18  ;;  %v2859_v58 = vsub.f32 %v2731_v11, %v1191_v23 }
 0x524   :  { %v1286_v33 = vmul.f32 1.442695, %v2859_v58 }
 0x525   :  { %v1193_v34 = vpop.xlane.xlu1 %1192 }
 0x526   :  { %2194 = vpow2.f32 %v1286_v33  ;;  %v2863_v3 = vsub.f32 %v2735_v13, %v1193_v34 }
 0x528   :  { %v2191_v36 = vpop.eup %2190  ;;  %v1288_v39 = vmul.f32 1.442695, %v2863_v3 }
 0x529   :  { %1346 = vadd.xlane.f32.xlu0 %v2191_v36  ;;  %v1195_v5 = vpop.xlane.xlu0 %1194 }
 0x52a   :  { %2196 = vpow2.f32 %v1288_v39  ;;  %v2867_v40 = vsub.f32 %v2739_v22, %v1195_v5 }
 0x52b   :  { %v1197_v42 = vpop.xlane.xlu1 %1196 }
 0x52c   :  { %v2193_v46 = vpop.eup %2192  ;;  %v1290_v11 = vmul.f32 1.442695, %v2867_v40  ;;  %v2871_v51 = vsub.f32 %v2743_v26, %v1197_v42 }
 0x52d   :  { %1348 = vadd.xlane.f32.xlu1 %v2193_v46 }
 0x52e   :  { %2198 = vpow2.f32 %v1290_v11  ;;  %v1292_v13 = vmul.f32 1.442695, %v2871_v51 }
 0x530   :  { %v2195_v44 = vpop.eup %2194  ;;  %2200 = vpow2.f32 %v1292_v13 }
 0x531   :  { %1350 = vadd.xlane.f32.xlu0 %v2195_v44  ;;  %v1199_v53 = vpop.xlane.xlu0 %1198 }
 0x532   :  { %v2875_v54 = vsub.f32 %v2747_v52, %v1199_v53 }
 0x533   :  { %v1201_v22 = vpop.xlane.xlu1 %1200 }
 0x534   :  { %v2197_v47 = vpop.eup %2196  ;;  %v1294_v59 = vmul.f32 1.442695, %v2875_v54  ;;  %v2879_v0 = vsub.f32 %v2751_v35, %v1201_v22 }
 0x535   :  { %1352 = vadd.xlane.f32.xlu1 %v2197_v47 }
 0x536   :  { %2202 = vpow2.f32 %v1294_v59  ;;  %v1296_v26 = vmul.f32 1.442695, %v2879_v0 }
 0x538   :  { %v2199_v1 = vpop.eup %2198  ;;  %2204 = vpow2.f32 %v1296_v26 }
 0x539   :  { %1354 = vadd.xlane.f32.xlu0 %v2199_v1  ;;  %v1203_v2 = vpop.xlane.xlu0 %1202 }
 0x53a   :  { %v2201_v4 = vpop.eup %2200  ;;  %v2883_v8 = vsub.f32 %v2755_v19, %v1203_v2 }
 0x53b   :  { %v1205_v52 = vpop.xlane.xlu1 %1204  ;;  %1356 = vadd.xlane.f32.xlu1 %v2201_v4 }
 0x53c   :  { %v1298_v12 = vmul.f32 1.442695, %v2883_v8  ;;  %v2887_v14 = vsub.f32 %v2759_v20, %v1205_v52 }
 0x53e   :  { %2206 = vpow2.f32 %v1298_v12  ;;  %v1300_v35 = vmul.f32 1.442695, %v2887_v14 }
 0x540   :  { %v2203_v15 = vpop.eup %2202  ;;  %2208 = vpow2.f32 %v1300_v35 }
 0x541   :  { %1358 = vadd.xlane.f32.xlu0 %v2203_v15  ;;  %v1207_v21 = vpop.xlane.xlu0 %1206 }
 0x542   :  { %v2205_v27 = vpop.eup %2204  ;;  %v2891_v28 = vsub.f32 %v2763_v37, %v1207_v21 }
 0x543   :  { %v1209_v19 = vpop.xlane.xlu1 %1208  ;;  %1360 = vadd.xlane.f32.xlu1 %v2205_v27 }
 0x544   :  { %v1302_v31 = vmul.f32 1.442695, %v2891_v28  ;;  %v2895_v56 = vsub.f32 %v2767_v38, %v1209_v19 }
 0x546   :  { %2210 = vpow2.f32 %v1302_v31  ;;  %v1304_v20 = vmul.f32 1.442695, %v2895_v56 }
 0x548   :  { %v2207_v62 = vpop.eup %2206  ;;  %2212 = vpow2.f32 %v1304_v20 }
 0x549   :  { %1362 = vadd.xlane.f32.xlu0 %v2207_v62  ;;  %v1211_v18 = vpop.xlane.xlu0 %1210 }
 0x54a   :  { %v2209_v23 = vpop.eup %2208  ;;  %v2899_v33 = vsub.f32 %v2771_v41, %v1211_v18 }
 0x54b   :  { %v1213_v37 = vpop.xlane.xlu1 %1212  ;;  %1364 = vadd.xlane.f32.xlu1 %v2209_v23 }
 0x54c   :  { %v1306_v34 = vmul.f32 1.442695, %v2899_v33  ;;  %v2903_v36 = vsub.f32 %v2775_v48, %v1213_v37 }
 0x54e   :  { %2214 = vpow2.f32 %v1306_v34  ;;  %v1308_v38 = vmul.f32 1.442695, %v2903_v36 }
 0x550   :  { %v2211_v39 = vpop.eup %2210  ;;  %2216 = vpow2.f32 %v1308_v38 }
 0x551   :  { %1366 = vadd.xlane.f32.xlu0 %v2211_v39  ;;  %v1215_v5 = vpop.xlane.xlu0 %1214 }
 0x552   :  { %v2213_v42 = vpop.eup %2212  ;;  %v2907_v46 = vsub.f32 %v2779_v57, %v1215_v5 }
 0x553   :  { %v1217_v41 = vpop.xlane.xlu1 %1216  ;;  %1368 = vadd.xlane.f32.xlu1 %v2213_v42 }
 0x554   :  { %v1310_v11 = vmul.f32 1.442695, %v2907_v46  ;;  %v2911_v13 = vsub.f32 %v2783_v49, %v1217_v41 }
 0x556   :  { %2218 = vpow2.f32 %v1310_v11  ;;  %v1312_v48 = vmul.f32 1.442695, %v2911_v13 }
 0x558   :  { %v2215_v44 = vpop.eup %2214  ;;  %2220 = vpow2.f32 %v1312_v48 }
 0x559   :  { %1370 = vadd.xlane.f32.xlu0 %v2215_v44  ;;  %v1219_v53 = vpop.xlane.xlu0 %1218 }
 0x55a   :  { %v2217_v22 = vpop.eup %2216  ;;  %v2915_v47 = vsub.f32 %v2787_v6, %v1219_v53 }
 0x55b   :  { %v1221_v57 = vpop.xlane.xlu1 %1220  ;;  %1372 = vadd.xlane.f32.xlu1 %v2217_v22 }
 0x55c   :  { %v1314_v59 = vmul.f32 1.442695, %v2915_v47  ;;  %v2919_v26 = vsub.f32 %v2791_v7, %v1221_v57 }
 0x55e   :  { %2222 = vpow2.f32 %v1314_v59  ;;  %v1316_v49 = vmul.f32 1.442695, %v2919_v26 }
 0x560   :  { %v2219_v1 = vpop.eup %2218  ;;  %2224 = vpow2.f32 %v1316_v49 }
 0x561   :  { %1374 = vadd.xlane.f32.xlu0 %v2219_v1  ;;  %v1223_v2 = vpop.xlane.xlu0 %1222 }
 0x562   :  { %v2221_v4 = vpop.eup %2220  ;;  %v2923_v52 = vsub.f32 %v2795_v16, %v1223_v2 }
 0x563   :  { %v1225_v6 = vpop.xlane.xlu1 %1224  ;;  %1376 = vadd.xlane.f32.xlu1 %v2221_v4 }
 0x564   :  { %v1318_v12 = vmul.f32 1.442695, %v2923_v52  ;;  %v2927_v35 = vsub.f32 %v2799_v17, %v1225_v6 }
 0x566   :  { %2226 = vpow2.f32 %v1318_v12  ;;  %v1320_v7 = vmul.f32 1.442695, %v2927_v35 }
 0x568   :  { %v2223_v15 = vpop.eup %2222  ;;  %2228 = vpow2.f32 %v1320_v7 }
 0x569   :  { %1378 = vadd.xlane.f32.xlu0 %v2223_v15  ;;  %v1227_v21 = vpop.xlane.xlu0 %1226 }
 0x56a   :  { %v2225_v27 = vpop.eup %2224  ;;  %v2931_v19 = vsub.f32 %v2803_v32, %v1227_v21 }
 0x56b   :  { %v1229_v16 = vpop.xlane.xlu1 %1228  ;;  %1380 = vadd.xlane.f32.xlu1 %v2225_v27 }
 0x56c   :  { %v1322_v31 = vmul.f32 1.442695, %v2931_v19  ;;  %v2935_v20 = vsub.f32 %v2807_v60, %v1229_v16 }
 0x56e   :  { %2230 = vpow2.f32 %v1322_v31  ;;  %v1324_v17 = vmul.f32 1.442695, %v2935_v20 }
 0x570   :  { %v2227_v62 = vpop.eup %2226  ;;  %2232 = vpow2.f32 %v1324_v17 }
 0x571   :  { %1382 = vadd.xlane.f32.xlu0 %v2227_v62  ;;  %v1231_v18 = vpop.xlane.xlu0 %1230 }
 0x572   :  { %v2229_v23 = vpop.eup %2228  ;;  %v2939_v37 = vsub.f32 %v2811_v24, %v1231_v18 }
 0x573   :  { %v1233_v32 = vpop.xlane.xlu1 %1232  ;;  %1384 = vadd.xlane.f32.xlu1 %v2229_v23 }
 0x574   :  { %v1326_v34 = vmul.f32 1.442695, %v2939_v37  ;;  %v2943_v38 = vsub.f32 %v2815_v25, %v1233_v32 }
 0x576   :  { %2234 = vpow2.f32 %v1326_v34  ;;  %v1328_v60 = vmul.f32 1.442695, %v2943_v38 }
 0x578   :  { %v2231_v39 = vpop.eup %2230  ;;  %2236 = vpow2.f32 %v1328_v60 }
 0x579   :  { %1386 = vadd.xlane.f32.xlu0 %v2231_v39  ;;  %v1235_v5 = vpop.xlane.xlu0 %1234 }
 0x57a   :  { %v2233_v42 = vpop.eup %2232  ;;  %v2947_v41 = vsub.f32 %v2819_v43, %v1235_v5 }
 0x57b   :  { %v1237_v24 = vpop.xlane.xlu1 %1236  ;;  %1388 = vadd.xlane.f32.xlu1 %v2233_v42 }
 0x57c   :  { %v1330_v11 = vmul.f32 1.442695, %v2947_v41  ;;  %v2951_v48 = vsub.f32 %v2823_v45, %v1237_v24 }
 0x57e   :  { %2238 = vpow2.f32 %v1330_v11  ;;  %v1332_v25 = vmul.f32 1.442695, %v2951_v48 }
 0x580   :  { %v2235_v44 = vpop.eup %2234  ;;  %2240 = vpow2.f32 %v1332_v25 }
 0x581   :  { %1390 = vadd.xlane.f32.xlu0 %v2235_v44  ;;  %v1239_v53 = vpop.xlane.xlu0 %1238 }
 0x582   :  { %v2237_v22 = vpop.eup %2236  ;;  %v2955_v57 = vsub.f32 %v2827_v55, %v1239_v53 }
 0x583   :  { %v1241_v43 = vpop.xlane.xlu1 %1240  ;;  %1392 = vadd.xlane.f32.xlu1 %v2237_v22 }
 0x584   :  { %v1334_v59 = vmul.f32 1.442695, %v2955_v57  ;;  %v2959_v49 = vsub.f32 %v2831_v50, %v1241_v43 }
 0x586   :  { %2242 = vpow2.f32 %v1334_v59  ;;  %v1336_v45 = vmul.f32 1.442695, %v2959_v49 }
 0x588   :  { %v2239_v1 = vpop.eup %2238  ;;  %2244 = vpow2.f32 %v1336_v45 }
 0x589   :  { %1394 = vadd.xlane.f32.xlu0 %v2239_v1  ;;  %v1243_v2 = vpop.xlane.xlu0 %1242 }
 0x58a   :  { %v2241_v4 = vpop.eup %2240  ;;  %v2963_v6 = vsub.f32 %v2835_v9, %v1243_v2 }
 0x58b   :  { %v1245_v55 = vpop.xlane.xlu1 %1244  ;;  %1396 = vadd.xlane.f32.xlu1 %v2241_v4 }
 0x58c   :  { %v1338_v12 = vmul.f32 1.442695, %v2963_v6  ;;  %v2967_v7 = vsub.f32 %v2839_v10, %v1245_v55 }
 0x58e   :  { %2246 = vpow2.f32 %v1338_v12  ;;  %v1340_v50 = vmul.f32 1.442695, %v2967_v7 }
 0x590   :  { %v2243_v15 = vpop.eup %2242  ;;  %2248 = vpow2.f32 %v1340_v50 }
 0x591   :  { %1398 = vadd.xlane.f32.xlu0 %v2243_v15  ;;  %v1247_v21 = vpop.xlane.xlu0 %1246 }
 0x592   :  { %v2245_v27 = vpop.eup %2244  ;;  %v2971_v16 = vsub.f32 %v2843_v29, %v1247_v21 }
 0x593   :  { %v1249_v9 = vpop.xlane.xlu1 %1248  ;;  %1400 = vadd.xlane.f32.xlu1 %v2245_v27 }
 0x594   :  { %v1342_v31 = vmul.f32 1.442695, %v2971_v16  ;;  %v2975_v17 = vsub.f32 %v2847_v30, %v1249_v9 }
 0x596   :  { %2250 = vpow2.f32 %v1342_v31  ;;  %v1344_v10 = vmul.f32 1.442695, %v2975_v17 }
 0x598   :  { %v2247_v62 = vpop.eup %2246  ;;  %2252 = vpow2.f32 %v1344_v10 }
 0x599   :  { %1402 = vadd.xlane.f32.xlu0 %v2247_v62 }
 0x59a   :  { %v2249_v18 = vpop.eup %2248 }
 0x59b   :  { %1404 = vadd.xlane.f32.xlu1 %v2249_v18 }
 0x5a0   :  { %v2251_v23 = vpop.eup %2250 }
 0x5a1   :  { %1406 = vadd.xlane.f32.xlu0 %v2251_v23 }
 0x5a2   :  { %v2253_v32 = vpop.eup %2252 }
 0x5a3   :  { %1408 = vadd.xlane.f32.xlu1 %v2253_v32 }
 0x5b6   :  { %v1347_v29 = vpop.xlane.xlu0 %1346 }
 0x5b7   :  { %2254 = vlog2.f32 %v1347_v29 }
 0x5ba   :  { %v1349_v34 = vpop.xlane.xlu1 %1348 }
 0x5bb   :  { %2256 = vlog2.f32 %v1349_v34 }
 0x5be   :  { %v1351_v60 = vpop.xlane.xlu0 %1350 }
 0x5bf   :  { %2258 = vlog2.f32 %v1351_v60 }
 0x5c1   :  { %v2255_v30 = vpop.eup %2254 }
 0x5c2   :  { %v1411_v39 = vmul.f32 0.6931472, %v2255_v30  ;;  %v1353_v5 = vpop.xlane.xlu1 %1352 }
 0x5c3   :  { %2260 = vlog2.f32 %v1353_v5 }
 0x5c4   :  { %v1474_v42 = vsub.f32 %v2851_v61, %v1411_v39 }
 0x5c5   :  { %v2257_v24 = vpop.eup %2256 }
 0x5c6   :  { %1506 = vst [vmem:[#allocation10] sm:$0xff] %v1474_v42  ;;  %v1413_v11 = vmul.f32 0.6931472, %v2257_v24  ;;  %v1355_v25 = vpop.xlane.xlu0 %1354 }
 0x5c7   :  { %2262 = vlog2.f32 %v1355_v25 }
 0x5c8   :  { %v1475_v44 = vsub.f32 %v2855_v63, %v1413_v11  ;;  %v1357_v53 = vpop.xlane.xlu1 %1356 }
 0x5c9   :  { %v2259_v22 = vpop.eup %2258  ;;  %2264 = vlog2.f32 %v1357_v53 }
 0x5ca   :  { %1507 = vst [vmem:[#allocation10 + $0x8] sm:$0xff] %v1475_v44  ;;  %v1415_v43 = vmul.f32 0.6931472, %v2259_v22 }
 0x5cc   :  { %v1476_v59 = vsub.f32 %v2859_v58, %v1415_v43 }
 0x5cd   :  { %v2261_v45 = vpop.eup %2260 }
 0x5ce   :  { %1508 = vst [vmem:[#allocation10 + $0x10] sm:$0xff] %v1476_v59  ;;  %v1417_v1 = vmul.f32 0.6931472, %v2261_v45  ;;  %v1359_v2 = vpop.xlane.xlu0 %1358 }
 0x5cf   :  { %2266 = vlog2.f32 %v1359_v2 }
 0x5d0   :  { %v1477_v61 = vsub.f32 %v2863_v3, %v1417_v1  ;;  %v1361_v4 = vpop.xlane.xlu1 %1360 }
 0x5d1   :  { %v2263_v55 = vpop.eup %2262  ;;  %2268 = vlog2.f32 %v1361_v4 }
 0x5d2   :  { %1509 = vst [vmem:[#allocation10 + $0x18] sm:$0xff] %v1477_v61  ;;  %v1419_v12 = vmul.f32 0.6931472, %v2263_v55 }
 0x5d3   :  { %v2265_v63 = vpop.eup %2264 }
 0x5d4   :  { %v1478_v50 = vsub.f32 %v2867_v40, %v1419_v12  ;;  %v1421_v15 = vmul.f32 0.6931472, %v2265_v63 }
 0x5d6   :  { %1510 = vst [vmem:[#allocation10 + $0x20] sm:$0xff] %v1478_v50  ;;  %v1479_v21 = vsub.f32 %v2871_v51, %v1421_v15  ;;  %v1363_v58 = vpop.xlane.xlu0 %1362 }
 0x5d7   :  { %2270 = vlog2.f32 %v1363_v58 }
 0x5d8   :  { %1511 = vst [vmem:[#allocation10 + $0x28] sm:$0xff] %v1479_v21  ;;  %v1365_v27 = vpop.xlane.xlu1 %1364 }
 0x5d9   :  { %v2267_v9 = vpop.eup %2266  ;;  %2272 = vlog2.f32 %v1365_v27 }
 0x5da   :  { %v1423_v31 = vmul.f32 0.6931472, %v2267_v9 }
 0x5db   :  { %v2269_v3 = vpop.eup %2268 }
 0x5dc   :  { %v1480_v10 = vsub.f32 %v2875_v54, %v1423_v31  ;;  %v1425_v62 = vmul.f32 0.6931472, %v2269_v3 }
 0x5de   :  { %1512 = vst [vmem:[#allocation10 + $0x30] sm:$0xff] %v1480_v10  ;;  %v1481_v18 = vsub.f32 %v2879_v0, %v1425_v62  ;;  %v1367_v23 = vpop.xlane.xlu0 %1366 }
 0x5df   :  { %2274 = vlog2.f32 %v1367_v23 }
 0x5e0   :  { %1513 = vst [vmem:[#allocation10 + $0x38] sm:$0xff] %v1481_v18  ;;  %v1369_v40 = vpop.xlane.xlu1 %1368 }
 0x5e1   :  { %v2271_v32 = vpop.eup %2270  ;;  %2276 = vlog2.f32 %v1369_v40 }
 0x5e2   :  { %v1427_v51 = vmul.f32 0.6931472, %v2271_v32 }
 0x5e3   :  { %v2273_v29 = vpop.eup %2272 }
 0x5e4   :  { %v1482_v34 = vsub.f32 %v2883_v8, %v1427_v51  ;;  %v1429_v60 = vmul.f32 0.6931472, %v2273_v29 }
 0x5e6   :  { %1514 = vst [vmem:[#allocation10 + $0x40] sm:$0xff] %v1482_v34  ;;  %v1483_v30 = vsub.f32 %v2887_v14, %v1429_v60  ;;  %v1371_v39 = vpop.xlane.xlu0 %1370 }
 0x5e7   :  { %2278 = vlog2.f32 %v1371_v39 }
 0x5e8   :  { %1515 = vst [vmem:[#allocation10 + $0x48] sm:$0xff] %v1483_v30  ;;  %v1373_v54 = vpop.xlane.xlu1 %1372 }
 0x5e9   :  { %v2275_v5 = vpop.eup %2274  ;;  %2280 = vlog2.f32 %v1373_v54 }
 0x5ea   :  { %v1431_v0 = vmul.f32 0.6931472, %v2275_v5 }
 0x5eb   :  { %v2277_v42 = vpop.eup %2276 }
 0x5ec   :  { %v1484_v24 = vsub.f32 %v2891_v28, %v1431_v0  ;;  %v1433_v11 = vmul.f32 0.6931472, %v2277_v42 }
 0x5ee   :  { %1516 = vst [vmem:[#allocation10 + $0x50] sm:$0xff] %v1484_v24  ;;  %v1485_v25 = vsub.f32 %v2895_v56, %v1433_v11  ;;  %v1375_v44 = vpop.xlane.xlu0 %1374 }
 0x5ef   :  { %2282 = vlog2.f32 %v1375_v44 }
 0x5f0   :  { %1517 = vst [vmem:[#allocation10 + $0x58] sm:$0xff] %v1485_v25  ;;  %v1377_v8 = vpop.xlane.xlu1 %1376 }
 0x5f1   :  { %v2279_v53 = vpop.eup %2278  ;;  %2284 = vlog2.f32 %v1377_v8 }
 0x5f2   :  { %v1435_v14 = vmul.f32 0.6931472, %v2279_v53 }
 0x5f3   :  { %v2281_v22 = vpop.eup %2280 }
 0x5f4   :  { %v1486_v43 = vsub.f32 %v2899_v33, %v1435_v14  ;;  %v1437_v59 = vmul.f32 0.6931472, %v2281_v22 }
 0x5f6   :  { %1518 = vst [vmem:[#allocation10 + $0x60] sm:$0xff] %v1486_v43  ;;  %v1487_v45 = vsub.f32 %v2903_v36, %v1437_v59  ;;  %v1379_v1 = vpop.xlane.xlu0 %1378 }
 0x5f7   :  { %2286 = vlog2.f32 %v1379_v1 }
 0x5f8   :  { %1519 = vst [vmem:[#allocation10 + $0x68] sm:$0xff] %v1487_v45  ;;  %v1381_v28 = vpop.xlane.xlu1 %1380 }
 0x5f9   :  { %v2283_v2 = vpop.eup %2282  ;;  %2288 = vlog2.f32 %v1381_v28 }
 0x5fa   :  { %v1439_v56 = vmul.f32 0.6931472, %v2283_v2 }
 0x5fb   :  { %v2285_v61 = vpop.eup %2284 }
 0x5fc   :  { %v1488_v4 = vsub.f32 %v2907_v46, %v1439_v56  ;;  %v1441_v55 = vmul.f32 0.6931472, %v2285_v61 }
 0x5fe   :  { %1520 = vst [vmem:[#allocation10 + $0x70] sm:$0xff] %v1488_v4  ;;  %v1489_v12 = vsub.f32 %v2911_v13, %v1441_v55  ;;  %v1383_v63 = vpop.xlane.xlu0 %1382 }
 0x5ff   :  { %2290 = vlog2.f32 %v1383_v63 }
 0x600   :  { %1521 = vst [vmem:[#allocation10 + $0x78] sm:$0xff] %v1489_v12  ;;  %v1385_v33 = vpop.xlane.xlu1 %1384 }
 0x601   :  { %v2287_v50 = vpop.eup %2286  ;;  %2292 = vlog2.f32 %v1385_v33 }
 0x602   :  { %v1443_v36 = vmul.f32 0.6931472, %v2287_v50 }
 0x603   :  { %v2289_v15 = vpop.eup %2288 }
 0x604   :  { %v1490_v21 = vsub.f32 %v2915_v47, %v1443_v36  ;;  %v1445_v58 = vmul.f32 0.6931472, %v2289_v15 }
 0x606   :  { %1522 = vst [vmem:[#allocation10 + $0x80] sm:$0xff] %v1490_v21  ;;  %v1491_v27 = vsub.f32 %v2919_v26, %v1445_v58  ;;  %v1387_v9 = vpop.xlane.xlu0 %1386 }
 0x607   :  { %2294 = vlog2.f32 %v1387_v9 }
 0x608   :  { %1523 = vst [vmem:[#allocation10 + $0x88] sm:$0xff] %v1491_v27  ;;  %v1389_v46 = vpop.xlane.xlu1 %1388 }
 0x609   :  { %v2291_v31 = vpop.eup %2290  ;;  %2296 = vlog2.f32 %v1389_v46 }
 0x60a   :  { %v1447_v13 = vmul.f32 0.6931472, %v2291_v31 }
 0x60b   :  { %v2293_v3 = vpop.eup %2292 }
 0x60c   :  { %v1492_v10 = vsub.f32 %v2923_v52, %v1447_v13  ;;  %v1449_v62 = vmul.f32 0.6931472, %v2293_v3 }
 0x60e   :  { %1524 = vst [vmem:[#allocation10 + $0x90] sm:$0xff] %v1492_v10  ;;  %v1493_v18 = vsub.f32 %v2927_v35, %v1449_v62  ;;  %v1391_v23 = vpop.xlane.xlu0 %1390 }
 0x60f   :  { %2298 = vlog2.f32 %v1391_v23 }
 0x610   :  { %1525 = vst [vmem:[#allocation10 + $0x98] sm:$0xff] %v1493_v18  ;;  %v1393_v47 = vpop.xlane.xlu1 %1392 }
 0x611   :  { %v2295_v40 = vpop.eup %2294  ;;  %2300 = vlog2.f32 %v1393_v47 }
 0x612   :  { %v1451_v26 = vmul.f32 0.6931472, %v2295_v40 }
 0x613   :  { %v2297_v32 = vpop.eup %2296 }
 0x614   :  { %v1494_v51 = vsub.f32 %v2931_v19, %v1451_v26  ;;  %v1453_v29 = vmul.f32 0.6931472, %v2297_v32 }
 0x616   :  { %1526 = vst [vmem:[#allocation10 + $0xa0] sm:$0xff] %v1494_v51  ;;  %v1495_v34 = vsub.f32 %v2935_v20, %v1453_v29  ;;  %v1395_v60 = vpop.xlane.xlu0 %1394 }
 0x617   :  { %2302 = vlog2.f32 %v1395_v60 }
 0x618   :  { %1527 = vst [vmem:[#allocation10 + $0xa8] sm:$0xff] %v1495_v34  ;;  %v1397_v52 = vpop.xlane.xlu1 %1396 }
 0x619   :  { %v2299_v30 = vpop.eup %2298  ;;  %2304 = vlog2.f32 %v1397_v52 }
 0x61a   :  { %v1455_v35 = vmul.f32 0.6931472, %v2299_v30 }
 0x61b   :  { %v2301_v39 = vpop.eup %2300 }
 0x61c   :  { %v1496_v54 = vsub.f32 %v2939_v37, %v1455_v35  ;;  %v1457_v5 = vmul.f32 0.6931472, %v2301_v39 }
 0x61e   :  { %1528 = vst [vmem:[#allocation10 + $0xb0] sm:$0xff] %v1496_v54  ;;  %v1497_v0 = vsub.f32 %v2943_v38, %v1457_v5  ;;  %v1399_v42 = vpop.xlane.xlu0 %1398 }
 0x61f   :  { %2306 = vlog2.f32 %v1399_v42 }
 0x620   :  { %1529 = vst [vmem:[#allocation10 + $0xb8] sm:$0xff] %v1497_v0  ;;  %v1401_v19 = vpop.xlane.xlu1 %1400 }
 0x621   :  { %v2303_v24 = vpop.eup %2302  ;;  %2308 = vlog2.f32 %v1401_v19 }
 0x622   :  { %v1459_v20 = vmul.f32 0.6931472, %v2303_v24 }
 0x623   :  { %v2305_v11 = vpop.eup %2304 }
 0x624   :  { %v1498_v25 = vsub.f32 %v2947_v41, %v1459_v20  ;;  %v1461_v44 = vmul.f32 0.6931472, %v2305_v11 }
 0x626   :  { %1530 = vst [vmem:[#allocation10 + $0xc0] sm:$0xff] %v1498_v25  ;;  %v1499_v8 = vsub.f32 %v2951_v48, %v1461_v44  ;;  %v1403_v53 = vpop.xlane.xlu0 %1402 }
 0x627   :  { %2310 = vlog2.f32 %v1403_v53 }
 0x628   :  { %1531 = vst [vmem:[#allocation10 + $0xc8] sm:$0xff] %v1499_v8  ;;  %v1405_v37 = vpop.xlane.xlu1 %1404 }
 0x629   :  { %v2307_v14 = vpop.eup %2306  ;;  %2312 = vlog2.f32 %v1405_v37 }
 0x62a   :  { %v1463_v38 = vmul.f32 0.6931472, %v2307_v14 }
 0x62b   :  { %v2309_v22 = vpop.eup %2308 }
 0x62c   :  { %v1500_v43 = vsub.f32 %v2955_v57, %v1463_v38  ;;  %v1465_v59 = vmul.f32 0.6931472, %v2309_v22 }
 0x62e   :  { %1532 = vst [vmem:[#allocation10 + $0xd0] sm:$0xff] %v1500_v43  ;;  %v1501_v45 = vsub.f32 %v2959_v49, %v1465_v59  ;;  %v1407_v1 = vpop.xlane.xlu0 %1406 }
 0x62f   :  { %2314 = vlog2.f32 %v1407_v1 }
 0x630   :  { %1533 = vst [vmem:[#allocation10 + $0xd8] sm:$0xff] %v1501_v45  ;;  %v1409_v41 = vpop.xlane.xlu1 %1408 }
 0x631   :  { %v2311_v28 = vpop.eup %2310  ;;  %2316 = vlog2.f32 %v1409_v41 }
 0x632   :  { %v1467_v48 = vmul.f32 0.6931472, %v2311_v28 }
 0x633   :  { %v2313_v2 = vpop.eup %2312 }
 0x634   :  { %v1502_v56 = vsub.f32 %v2963_v6, %v1467_v48  ;;  %v1469_v61 = vmul.f32 0.6931472, %v2313_v2 }
 0x636   :  { %1534 = vst [vmem:[#allocation10 + $0xe0] sm:$0xff] %v1502_v56  ;;  %v1503_v4 = vsub.f32 %v2967_v7, %v1469_v61 }
 0x638   :  { %1535 = vst [vmem:[#allocation10 + $0xe8] sm:$0xff] %v1503_v4 }
 0x639   :  { %v2315_v57 = vpop.eup %2314 }
 0x63a   :  { %v1471_v55 = vmul.f32 0.6931472, %v2315_v57 }
 0x63b   :  { %v2317_v12 = vpop.eup %2316 }
 0x63c   :  { %v1504_v49 = vsub.f32 %v2971_v16, %v1471_v55  ;;  %v1473_v63 = vmul.f32 0.6931472, %v2317_v12 }
 0x63e   :  { %1536 = vst [vmem:[#allocation10 + $0xf0] sm:$0xff] %v1504_v49  ;;  %v1505_v33 = vsub.f32 %v2975_v17, %v1473_v63 }
 0x640   :  { %1537 = vst [vmem:[#allocation10 + $0xf8] sm:$0xff] %v1505_v33 }
 0x641   :  { %2417 = shalt.err (!%p2414_p8)
}
 0x642   :  { %s2418_s28 = scalar_lea.hbm %s3031_s6, 4096 }
 0x643   :  { %p2419_p9 = scmp.ne.s32.totalorder %s3031_s6, %s2418_s28  ;;  %p2422_p10 = scmp.lt.u32.totalorder %s2418_s28, %s3031_s6 }
 0x645   :  { %p2424_p11 = pnand %p2422_p10, %p2419_p9 }
 0x647   :  { %2427 = shalt.err (!%p2424_p11)
}
 0x648   :  { %1549 = dma.vmem_to_hbm [thread:$0]  %s1544_s23, 4096, %s3031_s6, [#allocation4], %s2438_s9, %s2438_s9, %s2439_s10  }
 0x649   :  { %2434 = dma.done.wait [#allocation4], 4096  }
 0x64a   :  { %2435 = vsyncadd [#allocation4], 4294963200 }
 0x64b   :  { %1553 = vsyncpa [#allocation3], 1 }
 0x64c   :  { %1554 = vsyncpa [#allocation6], 1 }
 0x64d   :  { %1555 = vsyncpa [#allocation9], 1 }
 0x64e   :  { %1556 = vsyncpa [#allocation4], 1 }

</bundles_post_ra>
